<compile_context>
chip_gen: v6e
topology: v6e:2x2x1
jax: 0.10.0
libtpu: 0.0.40
codegen_flags: <defaults>
</compile_context>

<pallas_src>
import jax
import jax.numpy as jnp
from jax.experimental import pallas as pl
from jax.experimental.pallas import tpu as pltpu

# Lanes (B*N trajectories) per grid step.  Per-lane VMEM cost with double
# buffering is ~1.5 KiB (in 128 B + out 448 B, x2 buffers, + f32 delta/acc
# temporaries), so 8192 lanes ~= 12 MiB -- safely inside the 32 MiB scoped
# VMEM budget we request, on every generation (v5e/v6e/v7x).
_MAX_BLOCK_LANES = 8192


def _round_up(a, m):
    return ((a + m - 1) // m) * m


def _num_tensorcores():
    """Best-effort TensorCore-per-device count (used for grid balancing only)."""
    try:
        dev = jax.devices()[0]
        n = getattr(dev, "num_cores", None)
        if n is None:
            kind = str(getattr(dev, "device_kind", "")).lower()
            # v4 / v5p megacore and v7x expose 2 TensorCores per device.
            n = 2 if ("v7" in kind or "v4" in kind or "v5p" in kind) else 1
        return max(int(n), 1)
    except Exception:
        return 1


def motion_embedding_kernel(x_ref, w_ref, b_ref, o_ref):
    # x_ref: (F, T, R)    VMEM  -- lanes = trajectories (B*N)
    # w_ref: (E, F)       SMEM  -- PyTorch nn.Linear weight layout
    # b_ref: (E,)         SMEM
    # o_ref: (E, T-1, R)  VMEM
    n_feat = x_ref.shape[0]
    n_emb = o_ref.shape[0]

    # Cast BEFORE subtracting (avoids cancellation if x ever arrives as bf16),
    # then a sublane-shifted subtract gives the motion deltas.
    x = x_ref[...].astype(jnp.float32)              # (F, T, R)
    delta = x[:, 1:, :] - x[:, :-1, :]              # (F, T-1, R)

    # F-contraction as scalar-broadcast FMAs on the VPU.  Weight scalars come
    # from SMEM, so there is no lane slicing / broadcast work on the XLU and
    # every vmul/vadd operates on a fully dense 128-lane slab.  Stores are
    # full-lane (unmasked along lanes) for every output row e.
    for e in range(n_emb):                          # static unroll (E small)
        acc = delta[0] * w_ref[e, 0]
        for f in range(1, n_feat):                  # static unroll (F small)
            acc = acc + delta[f] * w_ref[e, f]
        o_ref[e] = (acc + b_ref[e]).astype(o_ref.dtype)


def motion_embedding(x, weight, bias, *, lanes_block=None, num_cores=None):
    """
    x:      [B, N, T, F]
    weight: [E, F]   (PyTorch nn.Linear layout)
    bias:   [E]
    returns [B, N, T-1, E]
    """
    B, N, T, Fdim = x.shape
    E = weight.shape[0]
    BN = B * N

    if num_cores is None:
        num_cores = _num_tensorcores()

    # ---- choose lanes-per-step R and the 1-D grid -----------------------
    if lanes_block is None:
        if BN <= _MAX_BLOCK_LANES and (num_cores <= 1 or BN < 128 * num_cores):
            R = BN                       # one maximal block, zero lane padding
        else:
            per_core = pl.cdiv(BN, num_cores)
            R = max(128, min(_MAX_BLOCK_LANES, _round_up(per_core, 128)))
    else:
        R = lanes_block

    if R == BN:
        grid = 1
        bn_pad = BN
    else:
        grid = pl.cdiv(BN, R)
        if num_cores > 1:
            grid = _round_up(grid, num_cores)   # even TensorCore load (v7x)
        bn_pad = grid * R

    # ---- lane-dense layout: (F, T, BN) ----------------------------------
    # One HBM pass for the layout change; the pad-to-block (when needed) is
    # fused into that same copy -- no standalone pad pass as in v1.
    x_t = jnp.transpose(x.reshape(BN, T, Fdim), (2, 1, 0))      # (F, T, BN)
    if bn_pad != BN:
        x_t = jnp.pad(x_t, ((0, 0), (0, 0), (0, bn_pad - BN)))

    itemsize = jnp.dtype(x.dtype).itemsize
    flops = (BN * (T - 1) * Fdim                  # delta subtractions
             + 2 * BN * (T - 1) * Fdim * E        # mul + add
             + BN * (T - 1) * E)                  # bias add
    bytes_accessed = ((bn_pad * T * Fdim + bn_pad * (T - 1) * E) * itemsize
                      + weight.size * jnp.dtype(weight.dtype).itemsize
                      + bias.size * jnp.dtype(bias.dtype).itemsize)

    out_t = pl.pallas_call(
        motion_embedding_kernel,
        out_shape=jax.ShapeDtypeStruct((E, T - 1, bn_pad), x.dtype),
        grid_spec=pltpu.PrefetchScalarGridSpec(
            num_scalar_prefetch=0,
            grid=(grid,),
            in_specs=[
                pl.BlockSpec((Fdim, T, R), lambda i: (0, 0, i)),
                pl.BlockSpec(memory_space=pltpu.MemorySpace.SMEM),   # weight
                pl.BlockSpec(memory_space=pltpu.MemorySpace.SMEM),   # bias
            ],
            out_specs=pl.BlockSpec((E, T - 1, R), lambda i: (0, 0, i)),
        ),
        compiler_params=pltpu.CompilerParams(
            dimension_semantics=("parallel",),
            vmem_limit_bytes=32 * 1024 * 1024,
        ),
        cost_estimate=pl.CostEstimate(
            flops=flops, transcendentals=0, bytes_accessed=bytes_accessed),
    )(x_t, weight, bias)

    # TODO(synk): if the downstream consumer (LSTM/GAT) can take the
    # channel-major (E, T-1, B*N) layout, return out_t directly and skip this
    # transpose-back (it is one full HBM pass over the output).
    out = jnp.transpose(out_t[:, :, :BN], (2, 1, 0))             # (BN, T-1, E)
    return out.reshape(B, N, T - 1, E)


if __name__ == "__main__":
    # Small shapes consistent with the module: n_in=4 features, n_emb=16.
    B, N, T, F, E = 2, 4, 8, 4, 16

    key = jax.random.PRNGKey(0)
    kx, kw, kb = jax.random.split(key, 3)

    x = jax.random.normal(kx, (B, N, T, F), dtype=jnp.float32)
    # Deterministic "nn.Linear(4, 16)" parameters (synthetic, not a checkpoint).
    bound = 1.0 / (F ** 0.5)
    weight = jax.random.uniform(kw, (E, F), minval=-bound, maxval=bound,
                                dtype=jnp.float32)
    bias = jax.random.uniform(kb, (E,), minval=-bound, maxval=bound,
                              dtype=jnp.float32)

    out = motion_embedding(x, weight, bias)
    out = jax.block_until_ready(out)

    # Pure-JAX reference for correctness.
    delta_ref = x[:, :, 1:, :] - x[:, :, :-1, :]
    ref = jnp.einsum("bntf,ef->bnte", delta_ref, weight) + bias
    assert out.shape == (B, N, T - 1, E)
    assert jnp.allclose(out, ref, atol=1e-5, rtol=1e-5)

    print("KERNEL_OK")
</pallas_src>

<mosaic_0001>
module attributes {stable_mosaic.version = 11 : i64} {
  func.func @motion_embedding_kernel(%arg0: i32, %arg1: memref<4x8x8xf32, #tpu.memory_space<vmem>>, %arg2: memref<16x4xf32, #tpu.memory_space<smem>>, %arg3: memref<16xf32, #tpu.memory_space<smem>>, %arg4: memref<16x7x8xf32, #tpu.memory_space<vmem>>) attributes {dimension_semantics = [#tpu.dimension_semantics<parallel>], iteration_bounds = array<i64: 1>, scalar_prefetch = 0 : i64, scratch_operands = 0 : i64, tpu.core_type = #tpu.core_type<tc>, window_params = [{transform_indices = @transform_0, window_bounds = array<i64: 4, 8, 8>}, {transform_indices = @transform_1, window_bounds = array<i64: 16, 4>}, {transform_indices = @transform_2, window_bounds = array<i64: 16>}, {transform_indices = @transform_3, window_bounds = array<i64: 16, 7, 8>}]} {
    %c0 = arith.constant 0 : index
    %c0_0 = arith.constant 0 : index
    %c0_1 = arith.constant 0 : index
    %0 = vector.load %arg1[%c0, %c0_0, %c0_1] : memref<4x8x8xf32, #tpu.memory_space<vmem>>, vector<4x8x8xf32>
    %1 = vector.extract_strided_slice %0 {offsets = [0, 1, 0], sizes = [4, 7, 8], strides = [1, 1, 1]} : vector<4x8x8xf32> to vector<4x7x8xf32>
    %2 = vector.extract_strided_slice %0 {offsets = [0, 0, 0], sizes = [4, 7, 8], strides = [1, 1, 1]} : vector<4x8x8xf32> to vector<4x7x8xf32>
    %3 = arith.subf %1, %2 : vector<4x7x8xf32>
    %4 = vector.extract_strided_slice %3 {offsets = [0, 0, 0], sizes = [1, 7, 8], strides = [1, 1, 1]} : vector<4x7x8xf32> to vector<1x7x8xf32>
    %5 = vector.shape_cast %4 : vector<1x7x8xf32> to vector<7x8xf32>
    %c0_2 = arith.constant 0 : index
    %c0_3 = arith.constant 0 : index
    %6 = memref.load %arg2[%c0_2, %c0_3] : memref<16x4xf32, #tpu.memory_space<smem>>
    %7 = vector.broadcast %6 : f32 to vector<7x8xf32>
    %8 = arith.mulf %5, %7 : vector<7x8xf32>
    %9 = vector.extract_strided_slice %3 {offsets = [1, 0, 0], sizes = [1, 7, 8], strides = [1, 1, 1]} : vector<4x7x8xf32> to vector<1x7x8xf32>
    %10 = vector.shape_cast %9 : vector<1x7x8xf32> to vector<7x8xf32>
    %c0_4 = arith.constant 0 : index
    %c1 = arith.constant 1 : index
    %11 = memref.load %arg2[%c0_4, %c1] : memref<16x4xf32, #tpu.memory_space<smem>>
    %12 = vector.broadcast %11 : f32 to vector<7x8xf32>
    %13 = arith.mulf %10, %12 : vector<7x8xf32>
    %14 = arith.addf %8, %13 : vector<7x8xf32>
    %15 = vector.extract_strided_slice %3 {offsets = [2, 0, 0], sizes = [1, 7, 8], strides = [1, 1, 1]} : vector<4x7x8xf32> to vector<1x7x8xf32>
    %16 = vector.shape_cast %15 : vector<1x7x8xf32> to vector<7x8xf32>
    %c0_5 = arith.constant 0 : index
    %c2 = arith.constant 2 : index
    %17 = memref.load %arg2[%c0_5, %c2] : memref<16x4xf32, #tpu.memory_space<smem>>
    %18 = vector.broadcast %17 : f32 to vector<7x8xf32>
    %19 = arith.mulf %16, %18 : vector<7x8xf32>
    %20 = arith.addf %14, %19 : vector<7x8xf32>
    %21 = vector.extract_strided_slice %3 {offsets = [3, 0, 0], sizes = [1, 7, 8], strides = [1, 1, 1]} : vector<4x7x8xf32> to vector<1x7x8xf32>
    %22 = vector.shape_cast %21 : vector<1x7x8xf32> to vector<7x8xf32>
    %c0_6 = arith.constant 0 : index
    %c3 = arith.constant 3 : index
    %23 = memref.load %arg2[%c0_6, %c3] : memref<16x4xf32, #tpu.memory_space<smem>>
    %24 = vector.broadcast %23 : f32 to vector<7x8xf32>
    %25 = arith.mulf %22, %24 : vector<7x8xf32>
    %26 = arith.addf %20, %25 : vector<7x8xf32>
    %c0_7 = arith.constant 0 : index
    %27 = memref.load %arg3[%c0_7] : memref<16xf32, #tpu.memory_space<smem>>
    %28 = vector.broadcast %27 : f32 to vector<7x8xf32>
    %29 = arith.addf %26, %28 : vector<7x8xf32>
    %c0_8 = arith.constant 0 : index
    %c0_9 = arith.constant 0 : index
    %c0_10 = arith.constant 0 : index
    %30 = vector.load %arg4[%c0_8, %c0_9, %c0_10] : memref<16x7x8xf32, #tpu.memory_space<vmem>>, vector<1x7x8xf32>
    %31 = vector.shape_cast %30 : vector<1x7x8xf32> to vector<7x8xf32>
    %32 = vector.shape_cast %29 : vector<7x8xf32> to vector<1x7x8xf32>
    tpu.vector_store %arg4[%c0_8, %c0_9, %c0_10], %32 {strides = array<i32>} : memref<16x7x8xf32, #tpu.memory_space<vmem>>, vector<1x7x8xf32>,
    %33 = vector.extract_strided_slice %3 {offsets = [0, 0, 0], sizes = [1, 7, 8], strides = [1, 1, 1]} : vector<4x7x8xf32> to vector<1x7x8xf32>
    %34 = vector.shape_cast %33 : vector<1x7x8xf32> to vector<7x8xf32>
    %c1_11 = arith.constant 1 : index
    %c0_12 = arith.constant 0 : index
    %35 = memref.load %arg2[%c1_11, %c0_12] : memref<16x4xf32, #tpu.memory_space<smem>>
    %36 = vector.broadcast %35 : f32 to vector<7x8xf32>
    %37 = arith.mulf %34, %36 : vector<7x8xf32>
    %38 = vector.extract_strided_slice %3 {offsets = [1, 0, 0], sizes = [1, 7, 8], strides = [1, 1, 1]} : vector<4x7x8xf32> to vector<1x7x8xf32>
    %39 = vector.shape_cast %38 : vector<1x7x8xf32> to vector<7x8xf32>
    %c1_13 = arith.constant 1 : index
    %c1_14 = arith.constant 1 : index
    %40 = memref.load %arg2[%c1_13, %c1_14] : memref<16x4xf32, #tpu.memory_space<smem>>
    %41 = vector.broadcast %40 : f32 to vector<7x8xf32>
    %42 = arith.mulf %39, %41 : vector<7x8xf32>
    %43 = arith.addf %37, %42 : vector<7x8xf32>
    %44 = vector.extract_strided_slice %3 {offsets = [2, 0, 0], sizes = [1, 7, 8], strides = [1, 1, 1]} : vector<4x7x8xf32> to vector<1x7x8xf32>
    %45 = vector.shape_cast %44 : vector<1x7x8xf32> to vector<7x8xf32>
    %c1_15 = arith.constant 1 : index
    %c2_16 = arith.constant 2 : index
    %46 = memref.load %arg2[%c1_15, %c2_16] : memref<16x4xf32, #tpu.memory_space<smem>>
    %47 = vector.broadcast %46 : f32 to vector<7x8xf32>
    %48 = arith.mulf %45, %47 : vector<7x8xf32>
    %49 = arith.addf %43, %48 : vector<7x8xf32>
    %50 = vector.extract_strided_slice %3 {offsets = [3, 0, 0], sizes = [1, 7, 8], strides = [1, 1, 1]} : vector<4x7x8xf32> to vector<1x7x8xf32>
    %51 = vector.shape_cast %50 : vector<1x7x8xf32> to vector<7x8xf32>
    %c1_17 = arith.constant 1 : index
    %c3_18 = arith.constant 3 : index
    %52 = memref.load %arg2[%c1_17, %c3_18] : memref<16x4xf32, #tpu.memory_space<smem>>
    %53 = vector.broadcast %52 : f32 to vector<7x8xf32>
    %54 = arith.mulf %51, %53 : vector<7x8xf32>
    %55 = arith.addf %49, %54 : vector<7x8xf32>
    %c1_19 = arith.constant 1 : index
    %56 = memref.load %arg3[%c1_19] : memref<16xf32, #tpu.memory_space<smem>>
    %57 = vector.broadcast %56 : f32 to vector<7x8xf32>
    %58 = arith.addf %55, %57 : vector<7x8xf32>
    %c1_20 = arith.constant 1 : index
    %c0_21 = arith.constant 0 : index
    %c0_22 = arith.constant 0 : index
    %59 = vector.load %arg4[%c1_20, %c0_21, %c0_22] : memref<16x7x8xf32, #tpu.memory_space<vmem>>, vector<1x7x8xf32>
    %60 = vector.shape_cast %59 : vector<1x7x8xf32> to vector<7x8xf32>
    %61 = vector.shape_cast %58 : vector<7x8xf32> to vector<1x7x8xf32>
    tpu.vector_store %arg4[%c1_20, %c0_21, %c0_22], %61 {strides = array<i32>} : memref<16x7x8xf32, #tpu.memory_space<vmem>>, vector<1x7x8xf32>,
    %62 = vector.extract_strided_slice %3 {offsets = [0, 0, 0], sizes = [1, 7, 8], strides = [1, 1, 1]} : vector<4x7x8xf32> to vector<1x7x8xf32>
    %63 = vector.shape_cast %62 : vector<1x7x8xf32> to vector<7x8xf32>
    %c2_23 = arith.constant 2 : index
    %c0_24 = arith.constant 0 : index
    %64 = memref.load %arg2[%c2_23, %c0_24] : memref<16x4xf32, #tpu.memory_space<smem>>
    %65 = vector.broadcast %64 : f32 to vector<7x8xf32>
    %66 = arith.mulf %63, %65 : vector<7x8xf32>
    %67 = vector.extract_strided_slice %3 {offsets = [1, 0, 0], sizes = [1, 7, 8], strides = [1, 1, 1]} : vector<4x7x8xf32> to vector<1x7x8xf32>
    %68 = vector.shape_cast %67 : vector<1x7x8xf32> to vector<7x8xf32>
    %c2_25 = arith.constant 2 : index
    %c1_26 = arith.constant 1 : index
    %69 = memref.load %arg2[%c2_25, %c1_26] : memref<16x4xf32, #tpu.memory_space<smem>>
    %70 = vector.broadcast %69 : f32 to vector<7x8xf32>
    %71 = arith.mulf %68, %70 : vector<7x8xf32>
    %72 = arith.addf %66, %71 : vector<7x8xf32>
    %73 = vector.extract_strided_slice %3 {offsets = [2, 0, 0], sizes = [1, 7, 8], strides = [1, 1, 1]} : vector<4x7x8xf32> to vector<1x7x8xf32>
    %74 = vector.shape_cast %73 : vector<1x7x8xf32> to vector<7x8xf32>
    %c2_27 = arith.constant 2 : index
    %c2_28 = arith.constant 2 : index
    %75 = memref.load %arg2[%c2_27, %c2_28] : memref<16x4xf32, #tpu.memory_space<smem>>
    %76 = vector.broadcast %75 : f32 to vector<7x8xf32>
    %77 = arith.mulf %74, %76 : vector<7x8xf32>
    %78 = arith.addf %72, %77 : vector<7x8xf32>
    %79 = vector.extract_strided_slice %3 {offsets = [3, 0, 0], sizes = [1, 7, 8], strides = [1, 1, 1]} : vector<4x7x8xf32> to vector<1x7x8xf32>
    %80 = vector.shape_cast %79 : vector<1x7x8xf32> to vector<7x8xf32>
    %c2_29 = arith.constant 2 : index
    %c3_30 = arith.constant 3 : index
    %81 = memref.load %arg2[%c2_29, %c3_30] : memref<16x4xf32, #tpu.memory_space<smem>>
    %82 = vector.broadcast %81 : f32 to vector<7x8xf32>
    %83 = arith.mulf %80, %82 : vector<7x8xf32>
    %84 = arith.addf %78, %83 : vector<7x8xf32>
    %c2_31 = arith.constant 2 : index
    %85 = memref.load %arg3[%c2_31] : memref<16xf32, #tpu.memory_space<smem>>
    %86 = vector.broadcast %85 : f32 to vector<7x8xf32>
    %87 = arith.addf %84, %86 : vector<7x8xf32>
    %c2_32 = arith.constant 2 : index
    %c0_33 = arith.constant 0 : index
    %c0_34 = arith.constant 0 : index
    %88 = vector.load %arg4[%c2_32, %c0_33, %c0_34] : memref<16x7x8xf32, #tpu.memory_space<vmem>>, vector<1x7x8xf32>
    %89 = vector.shape_cast %88 : vector<1x7x8xf32> to vector<7x8xf32>
    %90 = vector.shape_cast %87 : vector<7x8xf32> to vector<1x7x8xf32>
    tpu.vector_store %arg4[%c2_32, %c0_33, %c0_34], %90 {strides = array<i32>} : memref<16x7x8xf32, #tpu.memory_space<vmem>>, vector<1x7x8xf32>,
    %91 = vector.extract_strided_slice %3 {offsets = [0, 0, 0], sizes = [1, 7, 8], strides = [1, 1, 1]} : vector<4x7x8xf32> to vector<1x7x8xf32>
    %92 = vector.shape_cast %91 : vector<1x7x8xf32> to vector<7x8xf32>
    %c3_35 = arith.constant 3 : index
    %c0_36 = arith.constant 0 : index
    %93 = memref.load %arg2[%c3_35, %c0_36] : memref<16x4xf32, #tpu.memory_space<smem>>
    %94 = vector.broadcast %93 : f32 to vector<7x8xf32>
    %95 = arith.mulf %92, %94 : vector<7x8xf32>
    %96 = vector.extract_strided_slice %3 {offsets = [1, 0, 0], sizes = [1, 7, 8], strides = [1, 1, 1]} : vector<4x7x8xf32> to vector<1x7x8xf32>
    %97 = vector.shape_cast %96 : vector<1x7x8xf32> to vector<7x8xf32>
    %c3_37 = arith.constant 3 : index
    %c1_38 = arith.constant 1 : index
    %98 = memref.load %arg2[%c3_37, %c1_38] : memref<16x4xf32, #tpu.memory_space<smem>>
    %99 = vector.broadcast %98 : f32 to vector<7x8xf32>
    %100 = arith.mulf %97, %99 : vector<7x8xf32>
    %101 = arith.addf %95, %100 : vector<7x8xf32>
    %102 = vector.extract_strided_slice %3 {offsets = [2, 0, 0], sizes = [1, 7, 8], strides = [1, 1, 1]} : vector<4x7x8xf32> to vector<1x7x8xf32>
    %103 = vector.shape_cast %102 : vector<1x7x8xf32> to vector<7x8xf32>
    %c3_39 = arith.constant 3 : index
    %c2_40 = arith.constant 2 : index
    %104 = memref.load %arg2[%c3_39, %c2_40] : memref<16x4xf32, #tpu.memory_space<smem>>
    %105 = vector.broadcast %104 : f32 to vector<7x8xf32>
    %106 = arith.mulf %103, %105 : vector<7x8xf32>
    %107 = arith.addf %101, %106 : vector<7x8xf32>
    %108 = vector.extract_strided_slice %3 {offsets = [3, 0, 0], sizes = [1, 7, 8], strides = [1, 1, 1]} : vector<4x7x8xf32> to vector<1x7x8xf32>
    %109 = vector.shape_cast %108 : vector<1x7x8xf32> to vector<7x8xf32>
    %c3_41 = arith.constant 3 : index
    %c3_42 = arith.constant 3 : index
    %110 = memref.load %arg2[%c3_41, %c3_42] : memref<16x4xf32, #tpu.memory_space<smem>>
    %111 = vector.broadcast %110 : f32 to vector<7x8xf32>
    %112 = arith.mulf %109, %111 : vector<7x8xf32>
    %113 = arith.addf %107, %112 : vector<7x8xf32>
    %c3_43 = arith.constant 3 : index
    %114 = memref.load %arg3[%c3_43] : memref<16xf32, #tpu.memory_space<smem>>
    %115 = vector.broadcast %114 : f32 to vector<7x8xf32>
    %116 = arith.addf %113, %115 : vector<7x8xf32>
    %c3_44 = arith.constant 3 : index
    %c0_45 = arith.constant 0 : index
    %c0_46 = arith.constant 0 : index
    %117 = vector.load %arg4[%c3_44, %c0_45, %c0_46] : memref<16x7x8xf32, #tpu.memory_space<vmem>>, vector<1x7x8xf32>
    %118 = vector.shape_cast %117 : vector<1x7x8xf32> to vector<7x8xf32>
    %119 = vector.shape_cast %116 : vector<7x8xf32> to vector<1x7x8xf32>
    tpu.vector_store %arg4[%c3_44, %c0_45, %c0_46], %119 {strides = array<i32>} : memref<16x7x8xf32, #tpu.memory_space<vmem>>, vector<1x7x8xf32>,
    %120 = vector.extract_strided_slice %3 {offsets = [0, 0, 0], sizes = [1, 7, 8], strides = [1, 1, 1]} : vector<4x7x8xf32> to vector<1x7x8xf32>
    %121 = vector.shape_cast %120 : vector<1x7x8xf32> to vector<7x8xf32>
    %c4 = arith.constant 4 : index
    %c0_47 = arith.constant 0 : index
    %122 = memref.load %arg2[%c4, %c0_47] : memref<16x4xf32, #tpu.memory_space<smem>>
    %123 = vector.broadcast %122 : f32 to vector<7x8xf32>
    %124 = arith.mulf %121, %123 : vector<7x8xf32>
    %125 = vector.extract_strided_slice %3 {offsets = [1, 0, 0], sizes = [1, 7, 8], strides = [1, 1, 1]} : vector<4x7x8xf32> to vector<1x7x8xf32>
    %126 = vector.shape_cast %125 : vector<1x7x8xf32> to vector<7x8xf32>
    %c4_48 = arith.constant 4 : index
    %c1_49 = arith.constant 1 : index
    %127 = memref.load %arg2[%c4_48, %c1_49] : memref<16x4xf32, #tpu.memory_space<smem>>
    %128 = vector.broadcast %127 : f32 to vector<7x8xf32>
    %129 = arith.mulf %126, %128 : vector<7x8xf32>
    %130 = arith.addf %124, %129 : vector<7x8xf32>
    %131 = vector.extract_strided_slice %3 {offsets = [2, 0, 0], sizes = [1, 7, 8], strides = [1, 1, 1]} : vector<4x7x8xf32> to vector<1x7x8xf32>
    %132 = vector.shape_cast %131 : vector<1x7x8xf32> to vector<7x8xf32>
    %c4_50 = arith.constant 4 : index
    %c2_51 = arith.constant 2 : index
    %133 = memref.load %arg2[%c4_50, %c2_51] : memref<16x4xf32, #tpu.memory_space<smem>>
    %134 = vector.broadcast %133 : f32 to vector<7x8xf32>
    %135 = arith.mulf %132, %134 : vector<7x8xf32>
    %136 = arith.addf %130, %135 : vector<7x8xf32>
    %137 = vector.extract_strided_slice %3 {offsets = [3, 0, 0], sizes = [1, 7, 8], strides = [1, 1, 1]} : vector<4x7x8xf32> to vector<1x7x8xf32>
    %138 = vector.shape_cast %137 : vector<1x7x8xf32> to vector<7x8xf32>
    %c4_52 = arith.constant 4 : index
    %c3_53 = arith.constant 3 : index
    %139 = memref.load %arg2[%c4_52, %c3_53] : memref<16x4xf32, #tpu.memory_space<smem>>
    %140 = vector.broadcast %139 : f32 to vector<7x8xf32>
    %141 = arith.mulf %138, %140 : vector<7x8xf32>
    %142 = arith.addf %136, %141 : vector<7x8xf32>
    %c4_54 = arith.constant 4 : index
    %143 = memref.load %arg3[%c4_54] : memref<16xf32, #tpu.memory_space<smem>>
    %144 = vector.broadcast %143 : f32 to vector<7x8xf32>
    %145 = arith.addf %142, %144 : vector<7x8xf32>
    %c4_55 = arith.constant 4 : index
    %c0_56 = arith.constant 0 : index
    %c0_57 = arith.constant 0 : index
    %146 = vector.load %arg4[%c4_55, %c0_56, %c0_57] : memref<16x7x8xf32, #tpu.memory_space<vmem>>, vector<1x7x8xf32>
    %147 = vector.shape_cast %146 : vector<1x7x8xf32> to vector<7x8xf32>
    %148 = vector.shape_cast %145 : vector<7x8xf32> to vector<1x7x8xf32>
    tpu.vector_store %arg4[%c4_55, %c0_56, %c0_57], %148 {strides = array<i32>} : memref<16x7x8xf32, #tpu.memory_space<vmem>>, vector<1x7x8xf32>,
    %149 = vector.extract_strided_slice %3 {offsets = [0, 0, 0], sizes = [1, 7, 8], strides = [1, 1, 1]} : vector<4x7x8xf32> to vector<1x7x8xf32>
    %150 = vector.shape_cast %149 : vector<1x7x8xf32> to vector<7x8xf32>
    %c5 = arith.constant 5 : index
    %c0_58 = arith.constant 0 : index
    %151 = memref.load %arg2[%c5, %c0_58] : memref<16x4xf32, #tpu.memory_space<smem>>
    %152 = vector.broadcast %151 : f32 to vector<7x8xf32>
    %153 = arith.mulf %150, %152 : vector<7x8xf32>
    %154 = vector.extract_strided_slice %3 {offsets = [1, 0, 0], sizes = [1, 7, 8], strides = [1, 1, 1]} : vector<4x7x8xf32> to vector<1x7x8xf32>
    %155 = vector.shape_cast %154 : vector<1x7x8xf32> to vector<7x8xf32>
    %c5_59 = arith.constant 5 : index
    %c1_60 = arith.constant 1 : index
    %156 = memref.load %arg2[%c5_59, %c1_60] : memref<16x4xf32, #tpu.memory_space<smem>>
    %157 = vector.broadcast %156 : f32 to vector<7x8xf32>
    %158 = arith.mulf %155, %157 : vector<7x8xf32>
    %159 = arith.addf %153, %158 : vector<7x8xf32>
    %160 = vector.extract_strided_slice %3 {offsets = [2, 0, 0], sizes = [1, 7, 8], strides = [1, 1, 1]} : vector<4x7x8xf32> to vector<1x7x8xf32>
    %161 = vector.shape_cast %160 : vector<1x7x8xf32> to vector<7x8xf32>
    %c5_61 = arith.constant 5 : index
    %c2_62 = arith.constant 2 : index
    %162 = memref.load %arg2[%c5_61, %c2_62] : memref<16x4xf32, #tpu.memory_space<smem>>
    %163 = vector.broadcast %162 : f32 to vector<7x8xf32>
    %164 = arith.mulf %161, %163 : vector<7x8xf32>
    %165 = arith.addf %159, %164 : vector<7x8xf32>
    %166 = vector.extract_strided_slice %3 {offsets = [3, 0, 0], sizes = [1, 7, 8], strides = [1, 1, 1]} : vector<4x7x8xf32> to vector<1x7x8xf32>
    %167 = vector.shape_cast %166 : vector<1x7x8xf32> to vector<7x8xf32>
    %c5_63 = arith.constant 5 : index
    %c3_64 = arith.constant 3 : index
    %168 = memref.load %arg2[%c5_63, %c3_64] : memref<16x4xf32, #tpu.memory_space<smem>>
    %169 = vector.broadcast %168 : f32 to vector<7x8xf32>
    %170 = arith.mulf %167, %169 : vector<7x8xf32>
    %171 = arith.addf %165, %170 : vector<7x8xf32>
    %c5_65 = arith.constant 5 : index
    %172 = memref.load %arg3[%c5_65] : memref<16xf32, #tpu.memory_space<smem>>
    %173 = vector.broadcast %172 : f32 to vector<7x8xf32>
    %174 = arith.addf %171, %173 : vector<7x8xf32>
    %c5_66 = arith.constant 5 : index
    %c0_67 = arith.constant 0 : index
    %c0_68 = arith.constant 0 : index
    %175 = vector.load %arg4[%c5_66, %c0_67, %c0_68] : memref<16x7x8xf32, #tpu.memory_space<vmem>>, vector<1x7x8xf32>
    %176 = vector.shape_cast %175 : vector<1x7x8xf32> to vector<7x8xf32>
    %177 = vector.shape_cast %174 : vector<7x8xf32> to vector<1x7x8xf32>
    tpu.vector_store %arg4[%c5_66, %c0_67, %c0_68], %177 {strides = array<i32>} : memref<16x7x8xf32, #tpu.memory_space<vmem>>, vector<1x7x8xf32>,
    %178 = vector.extract_strided_slice %3 {offsets = [0, 0, 0], sizes = [1, 7, 8], strides = [1, 1, 1]} : vector<4x7x8xf32> to vector<1x7x8xf32>
    %179 = vector.shape_cast %178 : vector<1x7x8xf32> to vector<7x8xf32>
    %c6 = arith.constant 6 : index
    %c0_69 = arith.constant 0 : index
    %180 = memref.load %arg2[%c6, %c0_69] : memref<16x4xf32, #tpu.memory_space<smem>>
    %181 = vector.broadcast %180 : f32 to vector<7x8xf32>
    %182 = arith.mulf %179, %181 : vector<7x8xf32>
    %183 = vector.extract_strided_slice %3 {offsets = [1, 0, 0], sizes = [1, 7, 8], strides = [1, 1, 1]} : vector<4x7x8xf32> to vector<1x7x8xf32>
    %184 = vector.shape_cast %183 : vector<1x7x8xf32> to vector<7x8xf32>
    %c6_70 = arith.constant 6 : index
    %c1_71 = arith.constant 1 : index
    %185 = memref.load %arg2[%c6_70, %c1_71] : memref<16x4xf32, #tpu.memory_space<smem>>
    %186 = vector.broadcast %185 : f32 to vector<7x8xf32>
    %187 = arith.mulf %184, %186 : vector<7x8xf32>
    %188 = arith.addf %182, %187 : vector<7x8xf32>
    %189 = vector.extract_strided_slice %3 {offsets = [2, 0, 0], sizes = [1, 7, 8], strides = [1, 1, 1]} : vector<4x7x8xf32> to vector<1x7x8xf32>
    %190 = vector.shape_cast %189 : vector<1x7x8xf32> to vector<7x8xf32>
    %c6_72 = arith.constant 6 : index
    %c2_73 = arith.constant 2 : index
    %191 = memref.load %arg2[%c6_72, %c2_73] : memref<16x4xf32, #tpu.memory_space<smem>>
    %192 = vector.broadcast %191 : f32 to vector<7x8xf32>
    %193 = arith.mulf %190, %192 : vector<7x8xf32>
    %194 = arith.addf %188, %193 : vector<7x8xf32>
    %195 = vector.extract_strided_slice %3 {offsets = [3, 0, 0], sizes = [1, 7, 8], strides = [1, 1, 1]} : vector<4x7x8xf32> to vector<1x7x8xf32>
    %196 = vector.shape_cast %195 : vector<1x7x8xf32> to vector<7x8xf32>
    %c6_74 = arith.constant 6 : index
    %c3_75 = arith.constant 3 : index
    %197 = memref.load %arg2[%c6_74, %c3_75] : memref<16x4xf32, #tpu.memory_space<smem>>
    %198 = vector.broadcast %197 : f32 to vector<7x8xf32>
    %199 = arith.mulf %196, %198 : vector<7x8xf32>
    %200 = arith.addf %194, %199 : vector<7x8xf32>
    %c6_76 = arith.constant 6 : index
    %201 = memref.load %arg3[%c6_76] : memref<16xf32, #tpu.memory_space<smem>>
    %202 = vector.broadcast %201 : f32 to vector<7x8xf32>
    %203 = arith.addf %200, %202 : vector<7x8xf32>
    %c6_77 = arith.constant 6 : index
    %c0_78 = arith.constant 0 : index
    %c0_79 = arith.constant 0 : index
    %204 = vector.load %arg4[%c6_77, %c0_78, %c0_79] : memref<16x7x8xf32, #tpu.memory_space<vmem>>, vector<1x7x8xf32>
    %205 = vector.shape_cast %204 : vector<1x7x8xf32> to vector<7x8xf32>
    %206 = vector.shape_cast %203 : vector<7x8xf32> to vector<1x7x8xf32>
    tpu.vector_store %arg4[%c6_77, %c0_78, %c0_79], %206 {strides = array<i32>} : memref<16x7x8xf32, #tpu.memory_space<vmem>>, vector<1x7x8xf32>,
    %207 = vector.extract_strided_slice %3 {offsets = [0, 0, 0], sizes = [1, 7, 8], strides = [1, 1, 1]} : vector<4x7x8xf32> to vector<1x7x8xf32>
    %208 = vector.shape_cast %207 : vector<1x7x8xf32> to vector<7x8xf32>
    %c7 = arith.constant 7 : index
    %c0_80 = arith.constant 0 : index
    %209 = memref.load %arg2[%c7, %c0_80] : memref<16x4xf32, #tpu.memory_space<smem>>
    %210 = vector.broadcast %209 : f32 to vector<7x8xf32>
    %211 = arith.mulf %208, %210 : vector<7x8xf32>
    %212 = vector.extract_strided_slice %3 {offsets = [1, 0, 0], sizes = [1, 7, 8], strides = [1, 1, 1]} : vector<4x7x8xf32> to vector<1x7x8xf32>
    %213 = vector.shape_cast %212 : vector<1x7x8xf32> to vector<7x8xf32>
    %c7_81 = arith.constant 7 : index
    %c1_82 = arith.constant 1 : index
    %214 = memref.load %arg2[%c7_81, %c1_82] : memref<16x4xf32, #tpu.memory_space<smem>>
    %215 = vector.broadcast %214 : f32 to vector<7x8xf32>
    %216 = arith.mulf %213, %215 : vector<7x8xf32>
    %217 = arith.addf %211, %216 : vector<7x8xf32>
    %218 = vector.extract_strided_slice %3 {offsets = [2, 0, 0], sizes = [1, 7, 8], strides = [1, 1, 1]} : vector<4x7x8xf32> to vector<1x7x8xf32>
    %219 = vector.shape_cast %218 : vector<1x7x8xf32> to vector<7x8xf32>
    %c7_83 = arith.constant 7 : index
    %c2_84 = arith.constant 2 : index
    %220 = memref.load %arg2[%c7_83, %c2_84] : memref<16x4xf32, #tpu.memory_space<smem>>
    %221 = vector.broadcast %220 : f32 to vector<7x8xf32>
    %222 = arith.mulf %219, %221 : vector<7x8xf32>
    %223 = arith.addf %217, %222 : vector<7x8xf32>
    %224 = vector.extract_strided_slice %3 {offsets = [3, 0, 0], sizes = [1, 7, 8], strides = [1, 1, 1]} : vector<4x7x8xf32> to vector<1x7x8xf32>
    %225 = vector.shape_cast %224 : vector<1x7x8xf32> to vector<7x8xf32>
    %c7_85 = arith.constant 7 : index
    %c3_86 = arith.constant 3 : index
    %226 = memref.load %arg2[%c7_85, %c3_86] : memref<16x4xf32, #tpu.memory_space<smem>>
    %227 = vector.broadcast %226 : f32 to vector<7x8xf32>
    %228 = arith.mulf %225, %227 : vector<7x8xf32>
    %229 = arith.addf %223, %228 : vector<7x8xf32>
    %c7_87 = arith.constant 7 : index
    %230 = memref.load %arg3[%c7_87] : memref<16xf32, #tpu.memory_space<smem>>
    %231 = vector.broadcast %230 : f32 to vector<7x8xf32>
    %232 = arith.addf %229, %231 : vector<7x8xf32>
    %c7_88 = arith.constant 7 : index
    %c0_89 = arith.constant 0 : index
    %c0_90 = arith.constant 0 : index
    %233 = vector.load %arg4[%c7_88, %c0_89, %c0_90] : memref<16x7x8xf32, #tpu.memory_space<vmem>>, vector<1x7x8xf32>
    %234 = vector.shape_cast %233 : vector<1x7x8xf32> to vector<7x8xf32>
    %235 = vector.shape_cast %232 : vector<7x8xf32> to vector<1x7x8xf32>
    tpu.vector_store %arg4[%c7_88, %c0_89, %c0_90], %235 {strides = array<i32>} : memref<16x7x8xf32, #tpu.memory_space<vmem>>, vector<1x7x8xf32>,
    %236 = vector.extract_strided_slice %3 {offsets = [0, 0, 0], sizes = [1, 7, 8], strides = [1, 1, 1]} : vector<4x7x8xf32> to vector<1x7x8xf32>
    %237 = vector.shape_cast %236 : vector<1x7x8xf32> to vector<7x8xf32>
    %c8 = arith.constant 8 : index
    %c0_91 = arith.constant 0 : index
    %238 = memref.load %arg2[%c8, %c0_91] : memref<16x4xf32, #tpu.memory_space<smem>>
    %239 = vector.broadcast %238 : f32 to vector<7x8xf32>
    %240 = arith.mulf %237, %239 : vector<7x8xf32>
    %241 = vector.extract_strided_slice %3 {offsets = [1, 0, 0], sizes = [1, 7, 8], strides = [1, 1, 1]} : vector<4x7x8xf32> to vector<1x7x8xf32>
    %242 = vector.shape_cast %241 : vector<1x7x8xf32> to vector<7x8xf32>
    %c8_92 = arith.constant 8 : index
    %c1_93 = arith.constant 1 : index
    %243 = memref.load %arg2[%c8_92, %c1_93] : memref<16x4xf32, #tpu.memory_space<smem>>
    %244 = vector.broadcast %243 : f32 to vector<7x8xf32>
    %245 = arith.mulf %242, %244 : vector<7x8xf32>
    %246 = arith.addf %240, %245 : vector<7x8xf32>
    %247 = vector.extract_strided_slice %3 {offsets = [2, 0, 0], sizes = [1, 7, 8], strides = [1, 1, 1]} : vector<4x7x8xf32> to vector<1x7x8xf32>
    %248 = vector.shape_cast %247 : vector<1x7x8xf32> to vector<7x8xf32>
    %c8_94 = arith.constant 8 : index
    %c2_95 = arith.constant 2 : index
    %249 = memref.load %arg2[%c8_94, %c2_95] : memref<16x4xf32, #tpu.memory_space<smem>>
    %250 = vector.broadcast %249 : f32 to vector<7x8xf32>
    %251 = arith.mulf %248, %250 : vector<7x8xf32>
    %252 = arith.addf %246, %251 : vector<7x8xf32>
    %253 = vector.extract_strided_slice %3 {offsets = [3, 0, 0], sizes = [1, 7, 8], strides = [1, 1, 1]} : vector<4x7x8xf32> to vector<1x7x8xf32>
    %254 = vector.shape_cast %253 : vector<1x7x8xf32> to vector<7x8xf32>
    %c8_96 = arith.constant 8 : index
    %c3_97 = arith.constant 3 : index
    %255 = memref.load %arg2[%c8_96, %c3_97] : memref<16x4xf32, #tpu.memory_space<smem>>
    %256 = vector.broadcast %255 : f32 to vector<7x8xf32>
    %257 = arith.mulf %254, %256 : vector<7x8xf32>
    %258 = arith.addf %252, %257 : vector<7x8xf32>
    %c8_98 = arith.constant 8 : index
    %259 = memref.load %arg3[%c8_98] : memref<16xf32, #tpu.memory_space<smem>>
    %260 = vector.broadcast %259 : f32 to vector<7x8xf32>
    %261 = arith.addf %258, %260 : vector<7x8xf32>
    %c8_99 = arith.constant 8 : index
    %c0_100 = arith.constant 0 : index
    %c0_101 = arith.constant 0 : index
    %262 = vector.load %arg4[%c8_99, %c0_100, %c0_101] : memref<16x7x8xf32, #tpu.memory_space<vmem>>, vector<1x7x8xf32>
    %263 = vector.shape_cast %262 : vector<1x7x8xf32> to vector<7x8xf32>
    %264 = vector.shape_cast %261 : vector<7x8xf32> to vector<1x7x8xf32>
    tpu.vector_store %arg4[%c8_99, %c0_100, %c0_101], %264 {strides = array<i32>} : memref<16x7x8xf32, #tpu.memory_space<vmem>>, vector<1x7x8xf32>,
    %265 = vector.extract_strided_slice %3 {offsets = [0, 0, 0], sizes = [1, 7, 8], strides = [1, 1, 1]} : vector<4x7x8xf32> to vector<1x7x8xf32>
    %266 = vector.shape_cast %265 : vector<1x7x8xf32> to vector<7x8xf32>
    %c9 = arith.constant 9 : index
    %c0_102 = arith.constant 0 : index
    %267 = memref.load %arg2[%c9, %c0_102] : memref<16x4xf32, #tpu.memory_space<smem>>
    %268 = vector.broadcast %267 : f32 to vector<7x8xf32>
    %269 = arith.mulf %266, %268 : vector<7x8xf32>
    %270 = vector.extract_strided_slice %3 {offsets = [1, 0, 0], sizes = [1, 7, 8], strides = [1, 1, 1]} : vector<4x7x8xf32> to vector<1x7x8xf32>
    %271 = vector.shape_cast %270 : vector<1x7x8xf32> to vector<7x8xf32>
    %c9_103 = arith.constant 9 : index
    %c1_104 = arith.constant 1 : index
    %272 = memref.load %arg2[%c9_103, %c1_104] : memref<16x4xf32, #tpu.memory_space<smem>>
    %273 = vector.broadcast %272 : f32 to vector<7x8xf32>
    %274 = arith.mulf %271, %273 : vector<7x8xf32>
    %275 = arith.addf %269, %274 : vector<7x8xf32>
    %276 = vector.extract_strided_slice %3 {offsets = [2, 0, 0], sizes = [1, 7, 8], strides = [1, 1, 1]} : vector<4x7x8xf32> to vector<1x7x8xf32>
    %277 = vector.shape_cast %276 : vector<1x7x8xf32> to vector<7x8xf32>
    %c9_105 = arith.constant 9 : index
    %c2_106 = arith.constant 2 : index
    %278 = memref.load %arg2[%c9_105, %c2_106] : memref<16x4xf32, #tpu.memory_space<smem>>
    %279 = vector.broadcast %278 : f32 to vector<7x8xf32>
    %280 = arith.mulf %277, %279 : vector<7x8xf32>
    %281 = arith.addf %275, %280 : vector<7x8xf32>
    %282 = vector.extract_strided_slice %3 {offsets = [3, 0, 0], sizes = [1, 7, 8], strides = [1, 1, 1]} : vector<4x7x8xf32> to vector<1x7x8xf32>
    %283 = vector.shape_cast %282 : vector<1x7x8xf32> to vector<7x8xf32>
    %c9_107 = arith.constant 9 : index
    %c3_108 = arith.constant 3 : index
    %284 = memref.load %arg2[%c9_107, %c3_108] : memref<16x4xf32, #tpu.memory_space<smem>>
    %285 = vector.broadcast %284 : f32 to vector<7x8xf32>
    %286 = arith.mulf %283, %285 : vector<7x8xf32>
    %287 = arith.addf %281, %286 : vector<7x8xf32>
    %c9_109 = arith.constant 9 : index
    %288 = memref.load %arg3[%c9_109] : memref<16xf32, #tpu.memory_space<smem>>
    %289 = vector.broadcast %288 : f32 to vector<7x8xf32>
    %290 = arith.addf %287, %289 : vector<7x8xf32>
    %c9_110 = arith.constant 9 : index
    %c0_111 = arith.constant 0 : index
    %c0_112 = arith.constant 0 : index
    %291 = vector.load %arg4[%c9_110, %c0_111, %c0_112] : memref<16x7x8xf32, #tpu.memory_space<vmem>>, vector<1x7x8xf32>
    %292 = vector.shape_cast %291 : vector<1x7x8xf32> to vector<7x8xf32>
    %293 = vector.shape_cast %290 : vector<7x8xf32> to vector<1x7x8xf32>
    tpu.vector_store %arg4[%c9_110, %c0_111, %c0_112], %293 {strides = array<i32>} : memref<16x7x8xf32, #tpu.memory_space<vmem>>, vector<1x7x8xf32>,
    %294 = vector.extract_strided_slice %3 {offsets = [0, 0, 0], sizes = [1, 7, 8], strides = [1, 1, 1]} : vector<4x7x8xf32> to vector<1x7x8xf32>
    %295 = vector.shape_cast %294 : vector<1x7x8xf32> to vector<7x8xf32>
    %c10 = arith.constant 10 : index
    %c0_113 = arith.constant 0 : index
    %296 = memref.load %arg2[%c10, %c0_113] : memref<16x4xf32, #tpu.memory_space<smem>>
    %297 = vector.broadcast %296 : f32 to vector<7x8xf32>
    %298 = arith.mulf %295, %297 : vector<7x8xf32>
    %299 = vector.extract_strided_slice %3 {offsets = [1, 0, 0], sizes = [1, 7, 8], strides = [1, 1, 1]} : vector<4x7x8xf32> to vector<1x7x8xf32>
    %300 = vector.shape_cast %299 : vector<1x7x8xf32> to vector<7x8xf32>
    %c10_114 = arith.constant 10 : index
    %c1_115 = arith.constant 1 : index
    %301 = memref.load %arg2[%c10_114, %c1_115] : memref<16x4xf32, #tpu.memory_space<smem>>
    %302 = vector.broadcast %301 : f32 to vector<7x8xf32>
    %303 = arith.mulf %300, %302 : vector<7x8xf32>
    %304 = arith.addf %298, %303 : vector<7x8xf32>
    %305 = vector.extract_strided_slice %3 {offsets = [2, 0, 0], sizes = [1, 7, 8], strides = [1, 1, 1]} : vector<4x7x8xf32> to vector<1x7x8xf32>
    %306 = vector.shape_cast %305 : vector<1x7x8xf32> to vector<7x8xf32>
    %c10_116 = arith.constant 10 : index
    %c2_117 = arith.constant 2 : index
    %307 = memref.load %arg2[%c10_116, %c2_117] : memref<16x4xf32, #tpu.memory_space<smem>>
    %308 = vector.broadcast %307 : f32 to vector<7x8xf32>
    %309 = arith.mulf %306, %308 : vector<7x8xf32>
    %310 = arith.addf %304, %309 : vector<7x8xf32>
    %311 = vector.extract_strided_slice %3 {offsets = [3, 0, 0], sizes = [1, 7, 8], strides = [1, 1, 1]} : vector<4x7x8xf32> to vector<1x7x8xf32>
    %312 = vector.shape_cast %311 : vector<1x7x8xf32> to vector<7x8xf32>
    %c10_118 = arith.constant 10 : index
    %c3_119 = arith.constant 3 : index
    %313 = memref.load %arg2[%c10_118, %c3_119] : memref<16x4xf32, #tpu.memory_space<smem>>
    %314 = vector.broadcast %313 : f32 to vector<7x8xf32>
    %315 = arith.mulf %312, %314 : vector<7x8xf32>
    %316 = arith.addf %310, %315 : vector<7x8xf32>
    %c10_120 = arith.constant 10 : index
    %317 = memref.load %arg3[%c10_120] : memref<16xf32, #tpu.memory_space<smem>>
    %318 = vector.broadcast %317 : f32 to vector<7x8xf32>
    %319 = arith.addf %316, %318 : vector<7x8xf32>
    %c10_121 = arith.constant 10 : index
    %c0_122 = arith.constant 0 : index
    %c0_123 = arith.constant 0 : index
    %320 = vector.load %arg4[%c10_121, %c0_122, %c0_123] : memref<16x7x8xf32, #tpu.memory_space<vmem>>, vector<1x7x8xf32>
    %321 = vector.shape_cast %320 : vector<1x7x8xf32> to vector<7x8xf32>
    %322 = vector.shape_cast %319 : vector<7x8xf32> to vector<1x7x8xf32>
    tpu.vector_store %arg4[%c10_121, %c0_122, %c0_123], %322 {strides = array<i32>} : memref<16x7x8xf32, #tpu.memory_space<vmem>>, vector<1x7x8xf32>,
    %323 = vector.extract_strided_slice %3 {offsets = [0, 0, 0], sizes = [1, 7, 8], strides = [1, 1, 1]} : vector<4x7x8xf32> to vector<1x7x8xf32>
    %324 = vector.shape_cast %323 : vector<1x7x8xf32> to vector<7x8xf32>
    %c11 = arith.constant 11 : index
    %c0_124 = arith.constant 0 : index
    %325 = memref.load %arg2[%c11, %c0_124] : memref<16x4xf32, #tpu.memory_space<smem>>
    %326 = vector.broadcast %325 : f32 to vector<7x8xf32>
    %327 = arith.mulf %324, %326 : vector<7x8xf32>
    %328 = vector.extract_strided_slice %3 {offsets = [1, 0, 0], sizes = [1, 7, 8], strides = [1, 1, 1]} : vector<4x7x8xf32> to vector<1x7x8xf32>
    %329 = vector.shape_cast %328 : vector<1x7x8xf32> to vector<7x8xf32>
    %c11_125 = arith.constant 11 : index
    %c1_126 = arith.constant 1 : index
    %330 = memref.load %arg2[%c11_125, %c1_126] : memref<16x4xf32, #tpu.memory_space<smem>>
    %331 = vector.broadcast %330 : f32 to vector<7x8xf32>
    %332 = arith.mulf %329, %331 : vector<7x8xf32>
    %333 = arith.addf %327, %332 : vector<7x8xf32>
    %334 = vector.extract_strided_slice %3 {offsets = [2, 0, 0], sizes = [1, 7, 8], strides = [1, 1, 1]} : vector<4x7x8xf32> to vector<1x7x8xf32>
    %335 = vector.shape_cast %334 : vector<1x7x8xf32> to vector<7x8xf32>
    %c11_127 = arith.constant 11 : index
    %c2_128 = arith.constant 2 : index
    %336 = memref.load %arg2[%c11_127, %c2_128] : memref<16x4xf32, #tpu.memory_space<smem>>
    %337 = vector.broadcast %336 : f32 to vector<7x8xf32>
    %338 = arith.mulf %335, %337 : vector<7x8xf32>
    %339 = arith.addf %333, %338 : vector<7x8xf32>
    %340 = vector.extract_strided_slice %3 {offsets = [3, 0, 0], sizes = [1, 7, 8], strides = [1, 1, 1]} : vector<4x7x8xf32> to vector<1x7x8xf32>
    %341 = vector.shape_cast %340 : vector<1x7x8xf32> to vector<7x8xf32>
    %c11_129 = arith.constant 11 : index
    %c3_130 = arith.constant 3 : index
    %342 = memref.load %arg2[%c11_129, %c3_130] : memref<16x4xf32, #tpu.memory_space<smem>>
    %343 = vector.broadcast %342 : f32 to vector<7x8xf32>
    %344 = arith.mulf %341, %343 : vector<7x8xf32>
    %345 = arith.addf %339, %344 : vector<7x8xf32>
    %c11_131 = arith.constant 11 : index
    %346 = memref.load %arg3[%c11_131] : memref<16xf32, #tpu.memory_space<smem>>
    %347 = vector.broadcast %346 : f32 to vector<7x8xf32>
    %348 = arith.addf %345, %347 : vector<7x8xf32>
    %c11_132 = arith.constant 11 : index
    %c0_133 = arith.constant 0 : index
    %c0_134 = arith.constant 0 : index
    %349 = vector.load %arg4[%c11_132, %c0_133, %c0_134] : memref<16x7x8xf32, #tpu.memory_space<vmem>>, vector<1x7x8xf32>
    %350 = vector.shape_cast %349 : vector<1x7x8xf32> to vector<7x8xf32>
    %351 = vector.shape_cast %348 : vector<7x8xf32> to vector<1x7x8xf32>
    tpu.vector_store %arg4[%c11_132, %c0_133, %c0_134], %351 {strides = array<i32>} : memref<16x7x8xf32, #tpu.memory_space<vmem>>, vector<1x7x8xf32>,
    %352 = vector.extract_strided_slice %3 {offsets = [0, 0, 0], sizes = [1, 7, 8], strides = [1, 1, 1]} : vector<4x7x8xf32> to vector<1x7x8xf32>
    %353 = vector.shape_cast %352 : vector<1x7x8xf32> to vector<7x8xf32>
    %c12 = arith.constant 12 : index
    %c0_135 = arith.constant 0 : index
    %354 = memref.load %arg2[%c12, %c0_135] : memref<16x4xf32, #tpu.memory_space<smem>>
    %355 = vector.broadcast %354 : f32 to vector<7x8xf32>
    %356 = arith.mulf %353, %355 : vector<7x8xf32>
    %357 = vector.extract_strided_slice %3 {offsets = [1, 0, 0], sizes = [1, 7, 8], strides = [1, 1, 1]} : vector<4x7x8xf32> to vector<1x7x8xf32>
    %358 = vector.shape_cast %357 : vector<1x7x8xf32> to vector<7x8xf32>
    %c12_136 = arith.constant 12 : index
    %c1_137 = arith.constant 1 : index
    %359 = memref.load %arg2[%c12_136, %c1_137] : memref<16x4xf32, #tpu.memory_space<smem>>
    %360 = vector.broadcast %359 : f32 to vector<7x8xf32>
    %361 = arith.mulf %358, %360 : vector<7x8xf32>
    %362 = arith.addf %356, %361 : vector<7x8xf32>
    %363 = vector.extract_strided_slice %3 {offsets = [2, 0, 0], sizes = [1, 7, 8], strides = [1, 1, 1]} : vector<4x7x8xf32> to vector<1x7x8xf32>
    %364 = vector.shape_cast %363 : vector<1x7x8xf32> to vector<7x8xf32>
    %c12_138 = arith.constant 12 : index
    %c2_139 = arith.constant 2 : index
    %365 = memref.load %arg2[%c12_138, %c2_139] : memref<16x4xf32, #tpu.memory_space<smem>>
    %366 = vector.broadcast %365 : f32 to vector<7x8xf32>
    %367 = arith.mulf %364, %366 : vector<7x8xf32>
    %368 = arith.addf %362, %367 : vector<7x8xf32>
    %369 = vector.extract_strided_slice %3 {offsets = [3, 0, 0], sizes = [1, 7, 8], strides = [1, 1, 1]} : vector<4x7x8xf32> to vector<1x7x8xf32>
    %370 = vector.shape_cast %369 : vector<1x7x8xf32> to vector<7x8xf32>
    %c12_140 = arith.constant 12 : index
    %c3_141 = arith.constant 3 : index
    %371 = memref.load %arg2[%c12_140, %c3_141] : memref<16x4xf32, #tpu.memory_space<smem>>
    %372 = vector.broadcast %371 : f32 to vector<7x8xf32>
    %373 = arith.mulf %370, %372 : vector<7x8xf32>
    %374 = arith.addf %368, %373 : vector<7x8xf32>
    %c12_142 = arith.constant 12 : index
    %375 = memref.load %arg3[%c12_142] : memref<16xf32, #tpu.memory_space<smem>>
    %376 = vector.broadcast %375 : f32 to vector<7x8xf32>
    %377 = arith.addf %374, %376 : vector<7x8xf32>
    %c12_143 = arith.constant 12 : index
    %c0_144 = arith.constant 0 : index
    %c0_145 = arith.constant 0 : index
    %378 = vector.load %arg4[%c12_143, %c0_144, %c0_145] : memref<16x7x8xf32, #tpu.memory_space<vmem>>, vector<1x7x8xf32>
    %379 = vector.shape_cast %378 : vector<1x7x8xf32> to vector<7x8xf32>
    %380 = vector.shape_cast %377 : vector<7x8xf32> to vector<1x7x8xf32>
    tpu.vector_store %arg4[%c12_143, %c0_144, %c0_145], %380 {strides = array<i32>} : memref<16x7x8xf32, #tpu.memory_space<vmem>>, vector<1x7x8xf32>,
    %381 = vector.extract_strided_slice %3 {offsets = [0, 0, 0], sizes = [1, 7, 8], strides = [1, 1, 1]} : vector<4x7x8xf32> to vector<1x7x8xf32>
    %382 = vector.shape_cast %381 : vector<1x7x8xf32> to vector<7x8xf32>
    %c13 = arith.constant 13 : index
    %c0_146 = arith.constant 0 : index
    %383 = memref.load %arg2[%c13, %c0_146] : memref<16x4xf32, #tpu.memory_space<smem>>
    %384 = vector.broadcast %383 : f32 to vector<7x8xf32>
    %385 = arith.mulf %382, %384 : vector<7x8xf32>
    %386 = vector.extract_strided_slice %3 {offsets = [1, 0, 0], sizes = [1, 7, 8], strides = [1, 1, 1]} : vector<4x7x8xf32> to vector<1x7x8xf32>
    %387 = vector.shape_cast %386 : vector<1x7x8xf32> to vector<7x8xf32>
    %c13_147 = arith.constant 13 : index
    %c1_148 = arith.constant 1 : index
    %388 = memref.load %arg2[%c13_147, %c1_148] : memref<16x4xf32, #tpu.memory_space<smem>>
    %389 = vector.broadcast %388 : f32 to vector<7x8xf32>
    %390 = arith.mulf %387, %389 : vector<7x8xf32>
    %391 = arith.addf %385, %390 : vector<7x8xf32>
    %392 = vector.extract_strided_slice %3 {offsets = [2, 0, 0], sizes = [1, 7, 8], strides = [1, 1, 1]} : vector<4x7x8xf32> to vector<1x7x8xf32>
    %393 = vector.shape_cast %392 : vector<1x7x8xf32> to vector<7x8xf32>
    %c13_149 = arith.constant 13 : index
    %c2_150 = arith.constant 2 : index
    %394 = memref.load %arg2[%c13_149, %c2_150] : memref<16x4xf32, #tpu.memory_space<smem>>
    %395 = vector.broadcast %394 : f32 to vector<7x8xf32>
    %396 = arith.mulf %393, %395 : vector<7x8xf32>
    %397 = arith.addf %391, %396 : vector<7x8xf32>
    %398 = vector.extract_strided_slice %3 {offsets = [3, 0, 0], sizes = [1, 7, 8], strides = [1, 1, 1]} : vector<4x7x8xf32> to vector<1x7x8xf32>
    %399 = vector.shape_cast %398 : vector<1x7x8xf32> to vector<7x8xf32>
    %c13_151 = arith.constant 13 : index
    %c3_152 = arith.constant 3 : index
    %400 = memref.load %arg2[%c13_151, %c3_152] : memref<16x4xf32, #tpu.memory_space<smem>>
    %401 = vector.broadcast %400 : f32 to vector<7x8xf32>
    %402 = arith.mulf %399, %401 : vector<7x8xf32>
    %403 = arith.addf %397, %402 : vector<7x8xf32>
    %c13_153 = arith.constant 13 : index
    %404 = memref.load %arg3[%c13_153] : memref<16xf32, #tpu.memory_space<smem>>
    %405 = vector.broadcast %404 : f32 to vector<7x8xf32>
    %406 = arith.addf %403, %405 : vector<7x8xf32>
    %c13_154 = arith.constant 13 : index
    %c0_155 = arith.constant 0 : index
    %c0_156 = arith.constant 0 : index
    %407 = vector.load %arg4[%c13_154, %c0_155, %c0_156] : memref<16x7x8xf32, #tpu.memory_space<vmem>>, vector<1x7x8xf32>
    %408 = vector.shape_cast %407 : vector<1x7x8xf32> to vector<7x8xf32>
    %409 = vector.shape_cast %406 : vector<7x8xf32> to vector<1x7x8xf32>
    tpu.vector_store %arg4[%c13_154, %c0_155, %c0_156], %409 {strides = array<i32>} : memref<16x7x8xf32, #tpu.memory_space<vmem>>, vector<1x7x8xf32>,
    %410 = vector.extract_strided_slice %3 {offsets = [0, 0, 0], sizes = [1, 7, 8], strides = [1, 1, 1]} : vector<4x7x8xf32> to vector<1x7x8xf32>
    %411 = vector.shape_cast %410 : vector<1x7x8xf32> to vector<7x8xf32>
    %c14 = arith.constant 14 : index
    %c0_157 = arith.constant 0 : index
    %412 = memref.load %arg2[%c14, %c0_157] : memref<16x4xf32, #tpu.memory_space<smem>>
    %413 = vector.broadcast %412 : f32 to vector<7x8xf32>
    %414 = arith.mulf %411, %413 : vector<7x8xf32>
    %415 = vector.extract_strided_slice %3 {offsets = [1, 0, 0], sizes = [1, 7, 8], strides = [1, 1, 1]} : vector<4x7x8xf32> to vector<1x7x8xf32>
    %416 = vector.shape_cast %415 : vector<1x7x8xf32> to vector<7x8xf32>
    %c14_158 = arith.constant 14 : index
    %c1_159 = arith.constant 1 : index
    %417 = memref.load %arg2[%c14_158, %c1_159] : memref<16x4xf32, #tpu.memory_space<smem>>
    %418 = vector.broadcast %417 : f32 to vector<7x8xf32>
    %419 = arith.mulf %416, %418 : vector<7x8xf32>
    %420 = arith.addf %414, %419 : vector<7x8xf32>
    %421 = vector.extract_strided_slice %3 {offsets = [2, 0, 0], sizes = [1, 7, 8], strides = [1, 1, 1]} : vector<4x7x8xf32> to vector<1x7x8xf32>
    %422 = vector.shape_cast %421 : vector<1x7x8xf32> to vector<7x8xf32>
    %c14_160 = arith.constant 14 : index
    %c2_161 = arith.constant 2 : index
    %423 = memref.load %arg2[%c14_160, %c2_161] : memref<16x4xf32, #tpu.memory_space<smem>>
    %424 = vector.broadcast %423 : f32 to vector<7x8xf32>
    %425 = arith.mulf %422, %424 : vector<7x8xf32>
    %426 = arith.addf %420, %425 : vector<7x8xf32>
    %427 = vector.extract_strided_slice %3 {offsets = [3, 0, 0], sizes = [1, 7, 8], strides = [1, 1, 1]} : vector<4x7x8xf32> to vector<1x7x8xf32>
    %428 = vector.shape_cast %427 : vector<1x7x8xf32> to vector<7x8xf32>
    %c14_162 = arith.constant 14 : index
    %c3_163 = arith.constant 3 : index
    %429 = memref.load %arg2[%c14_162, %c3_163] : memref<16x4xf32, #tpu.memory_space<smem>>
    %430 = vector.broadcast %429 : f32 to vector<7x8xf32>
    %431 = arith.mulf %428, %430 : vector<7x8xf32>
    %432 = arith.addf %426, %431 : vector<7x8xf32>
    %c14_164 = arith.constant 14 : index
    %433 = memref.load %arg3[%c14_164] : memref<16xf32, #tpu.memory_space<smem>>
    %434 = vector.broadcast %433 : f32 to vector<7x8xf32>
    %435 = arith.addf %432, %434 : vector<7x8xf32>
    %c14_165 = arith.constant 14 : index
    %c0_166 = arith.constant 0 : index
    %c0_167 = arith.constant 0 : index
    %436 = vector.load %arg4[%c14_165, %c0_166, %c0_167] : memref<16x7x8xf32, #tpu.memory_space<vmem>>, vector<1x7x8xf32>
    %437 = vector.shape_cast %436 : vector<1x7x8xf32> to vector<7x8xf32>
    %438 = vector.shape_cast %435 : vector<7x8xf32> to vector<1x7x8xf32>
    tpu.vector_store %arg4[%c14_165, %c0_166, %c0_167], %438 {strides = array<i32>} : memref<16x7x8xf32, #tpu.memory_space<vmem>>, vector<1x7x8xf32>,
    %439 = vector.extract_strided_slice %3 {offsets = [0, 0, 0], sizes = [1, 7, 8], strides = [1, 1, 1]} : vector<4x7x8xf32> to vector<1x7x8xf32>
    %440 = vector.shape_cast %439 : vector<1x7x8xf32> to vector<7x8xf32>
    %c15 = arith.constant 15 : index
    %c0_168 = arith.constant 0 : index
    %441 = memref.load %arg2[%c15, %c0_168] : memref<16x4xf32, #tpu.memory_space<smem>>
    %442 = vector.broadcast %441 : f32 to vector<7x8xf32>
    %443 = arith.mulf %440, %442 : vector<7x8xf32>
    %444 = vector.extract_strided_slice %3 {offsets = [1, 0, 0], sizes = [1, 7, 8], strides = [1, 1, 1]} : vector<4x7x8xf32> to vector<1x7x8xf32>
    %445 = vector.shape_cast %444 : vector<1x7x8xf32> to vector<7x8xf32>
    %c15_169 = arith.constant 15 : index
    %c1_170 = arith.constant 1 : index
    %446 = memref.load %arg2[%c15_169, %c1_170] : memref<16x4xf32, #tpu.memory_space<smem>>
    %447 = vector.broadcast %446 : f32 to vector<7x8xf32>
    %448 = arith.mulf %445, %447 : vector<7x8xf32>
    %449 = arith.addf %443, %448 : vector<7x8xf32>
    %450 = vector.extract_strided_slice %3 {offsets = [2, 0, 0], sizes = [1, 7, 8], strides = [1, 1, 1]} : vector<4x7x8xf32> to vector<1x7x8xf32>
    %451 = vector.shape_cast %450 : vector<1x7x8xf32> to vector<7x8xf32>
    %c15_171 = arith.constant 15 : index
    %c2_172 = arith.constant 2 : index
    %452 = memref.load %arg2[%c15_171, %c2_172] : memref<16x4xf32, #tpu.memory_space<smem>>
    %453 = vector.broadcast %452 : f32 to vector<7x8xf32>
    %454 = arith.mulf %451, %453 : vector<7x8xf32>
    %455 = arith.addf %449, %454 : vector<7x8xf32>
    %456 = vector.extract_strided_slice %3 {offsets = [3, 0, 0], sizes = [1, 7, 8], strides = [1, 1, 1]} : vector<4x7x8xf32> to vector<1x7x8xf32>
    %457 = vector.shape_cast %456 : vector<1x7x8xf32> to vector<7x8xf32>
    %c15_173 = arith.constant 15 : index
    %c3_174 = arith.constant 3 : index
    %458 = memref.load %arg2[%c15_173, %c3_174] : memref<16x4xf32, #tpu.memory_space<smem>>
    %459 = vector.broadcast %458 : f32 to vector<7x8xf32>
    %460 = arith.mulf %457, %459 : vector<7x8xf32>
    %461 = arith.addf %455, %460 : vector<7x8xf32>
    %c15_175 = arith.constant 15 : index
    %462 = memref.load %arg3[%c15_175] : memref<16xf32, #tpu.memory_space<smem>>
    %463 = vector.broadcast %462 : f32 to vector<7x8xf32>
    %464 = arith.addf %461, %463 : vector<7x8xf32>
    %c15_176 = arith.constant 15 : index
    %c0_177 = arith.constant 0 : index
    %c0_178 = arith.constant 0 : index
    %465 = vector.load %arg4[%c15_176, %c0_177, %c0_178] : memref<16x7x8xf32, #tpu.memory_space<vmem>>, vector<1x7x8xf32>
    %466 = vector.shape_cast %465 : vector<1x7x8xf32> to vector<7x8xf32>
    %467 = vector.shape_cast %464 : vector<7x8xf32> to vector<1x7x8xf32>
    tpu.vector_store %arg4[%c15_176, %c0_177, %c0_178], %467 {strides = array<i32>} : memref<16x7x8xf32, #tpu.memory_space<vmem>>, vector<1x7x8xf32>,
    return
  }
  func.func @transform_0(%arg0: i32) -> (i32, i32, i32) {
    %c0_i32 = arith.constant 0 : i32
    %c0_i32_0 = arith.constant 0 : i32
    %c0_i32_1 = arith.constant 0 : i32
    return %c0_i32, %c0_i32_0, %arg0 : i32, i32, i32
  }
  func.func @transform_1(%arg0: i32) -> (i32, i32) {
    %c0_i32 = arith.constant 0 : i32
    %c0_i32_0 = arith.constant 0 : i32
    %c0_i32_1 = arith.constant 0 : i32
    return %c0_i32, %c0_i32_0 : i32, i32
  }
  func.func @transform_2(%arg0: i32) -> i32 {
    %c0_i32 = arith.constant 0 : i32
    %c0_i32_0 = arith.constant 0 : i32
    return %c0_i32 : i32
  }
  func.func @transform_3(%arg0: i32) -> (i32, i32, i32) {
    %c0_i32 = arith.constant 0 : i32
    %c0_i32_0 = arith.constant 0 : i32
    %c0_i32_1 = arith.constant 0 : i32
    return %c0_i32, %c0_i32_0, %arg0 : i32, i32, i32
  }
}

</mosaic_0001>

<bundles_post_ra>
// kernel: tpu_custom_call.1
= control target key start
LH: loop header
LB: loop body
LE: loop exit
PB: predicated region body
PF: predicated region fallthrough
CT: control target
= control target key end

     0   :  { %8 = vsyncpa [#allocation3], 0  ;;  %s765_s0 = inlined_call_operand.hbm [shape: f32[4,8,8], index: 0, kind: input, shape index: {}]   ;;  %s766_s1 = inlined_call_operand.vmem [shape: f32[16,4], index: 1, kind: input, shape index: {}]   ;;  %s767_s2 = inlined_call_operand.vmem [shape: f32[16], index: 2, kind: input, shape index: {}]   ;;  %s768_s3 = inlined_call_operand.vmem [shape: f32[16,7,8], index: 3, kind: output, shape index: {}]  }
   0x1   :  { %9 = vsyncpa [#allocation4], 0 }
   0x2   :  { %10 = vsyncpa [#allocation7], 0  ;;  %s550_s12 = smov [#allocation2]   ;;  %s28_s16 = sshll.u32 %s766_s1, 4  ;;  %s29_s16 = int_to_ptr.vmem [resolvable:$true] %s28_s16 }
   0x3   :  { %s16_s13 = sshll.u32 %s550_s12, 4  ;;  %s17_s13 = int_to_ptr.vmem [resolvable:$true] %s16_s13 }
   0x4   :  { %s508_s17 = scalar_lea.vmem %s17_s13, 512  ;;  %p513_p1 = scmp.lt.s32.totalorder %s17_s13, %s17_s13 }
   0x5   :  { %p509_p0 = scmp.ne.s32.totalorder %s17_s13, %s508_s17  ;;  %p514_p2 = scmp.lt.s32.totalorder %s508_s17, %s508_s17 }
   0x7   :  { %p515_p3 = por %p514_p2, %p513_p1 }
   0x9   :  { %p516_p4 = pnand %p515_p3, %p509_p0 }
   0xb   :  { %519 = shalt.err (!%p516_p4)
}
   0xc   :  { %s551_s18 = smov 128   ;;  %s552_s19 = smov 8  }
   0xd   :  { %22 = dma.hbm_to_vmem [thread:$0]  %s765_s0, 512, %s17_s13, [#allocation3], %s551_s18, %s551_s18, %s552_s19  }
   0xe   :  { %s520_s22 = scalar_lea.vmem %s29_s16, 256  ;;  %p525_p6 = scmp.lt.s32.totalorder %s29_s16, %s29_s16 }
   0xf   :  { %p521_p5 = scmp.ne.s32.totalorder %s29_s16, %s520_s22  ;;  %p526_p7 = scmp.lt.s32.totalorder %s520_s22, %s520_s22 }
  0x11   :  { %p527_p8 = por %p526_p7, %p525_p6 }
  0x13   :  { %p528_p9 = pnand %p527_p8, %p521_p5 }
  0x15   :  { %531 = shalt.err (!%p528_p9)
}
  0x16   :  { %s553_s1 = smov [#allocation5]   ;;  %s41_s25 = sshll.u32 %s767_s2, 4  ;;  %s42_s25 = int_to_ptr.vmem [resolvable:$true] %s41_s25 }
  0x17   :  { %34 = dma.vmem_to_smem %s29_s16, 256, %s553_s1, [#allocation4], %s551_s18, %s551_s18, %s552_s19  }
  0x18   :  { %s532_s26 = scalar_lea.vmem %s42_s25, 16  ;;  %p537_p11 = scmp.lt.s32.totalorder %s42_s25, %s42_s25 }
  0x19   :  { %p533_p10 = scmp.ne.s32.totalorder %s42_s25, %s532_s26  ;;  %p538_p12 = scmp.lt.s32.totalorder %s532_s26, %s532_s26 }
  0x1b   :  { %p539_p13 = por %p538_p12, %p537_p11 }
  0x1d   :  { %p540_p0 = pnand %p539_p13, %p533_p10 }
  0x1f   :  { %543 = shalt.err (!%p540_p0)
}
  0x20   :  { %s554_s0 = smov [#allocation6]  }
  0x21   :  { %44 = dma.vmem_to_smem %s42_s25, 16, %s554_s0, [#allocation7]  }
  0x22   :  { %544 = dma.done.wait [#allocation3], 512  }
  0x23   :  { %545 = vsyncadd [#allocation3], 4294966784 }
  0x24   :  { %546 = dma.done.wait [#allocation4], 256  }
  0x25   :  { %547 = vsyncadd [#allocation4], 4294967040 }
  0x26   :  { %548 = dma.done.wait [#allocation7], 16  }
  0x27   :  { %549 = vsyncadd [#allocation7], 4294967280 }
  0x28   :  { %54 = sfence }
  0x29   :  { %v55_v0 = vld [vmem:[#allocation2] sm:$0xff]  ;;  %v56_v1 = vld [vmem:[#allocation2 + $0x8] sm:$0xff]  ;;  %v57_v2 = vld [vmem:[#allocation2 + $0x10] sm:$0xff]  ;;  %s75_s2 = sld [smem:[#allocation5]]  ;;  %vm93_vm0 = vcmask 64513  }
  0x2a   :  { %v58_v3 = vld [vmem:[#allocation2 + $0x18] sm:$0xff]  ;;  %v63_v4 = vrot.slane %v55_v0, 7  ;;  %v64_v5 = vrot.slane %v56_v1, 7  ;;  %v65_v6 = vrot.slane %v57_v2, 7  ;;  %s402_s27 = sld [smem:[#allocation5 + $0x1]] }
  0x2b   :  { %v66_v7 = vrot.slane %v58_v3, 7  ;;  %s403_s28 = sld [smem:[#allocation5 + $0x2]] }
  0x2c   :  { %v584_v8 = vsub.f32 %v55_v0, %v63_v4  ;;  %s404_s29 = sld [smem:[#allocation5 + $0x3]]  ;;  %v586_v9 = vsub.f32 %v56_v1, %v64_v5  ;;  %v590_v10 = vsub.f32 %v57_v2, %v65_v6 }
  0x2d   :  { %s588_s30 = sld [smem:[#allocation6]]  ;;  %v592_v11 = vsub.f32 %v58_v3, %v66_v7 }
  0x2e   :  { %s405_s4 = sld [smem:[#allocation5 + $0x80]] }
  0x2f   :  { %v76_v12 = vstv %s75_s2  ;;  %s406_s5 = sld [smem:[#allocation5 + $0x81]] }
  0x30   :  { %v77_v13 = vmul.f32 %v76_v12, %v584_v8  ;;  %v79_v14 = vstv %s402_s27  ;;  %s407_s6 = sld [smem:[#allocation5 + $0x82]] }
  0x31   :  { %v80_v15 = vmul.f32 %v79_v14, %v586_v9  ;;  %v83_v16 = vstv %s403_s28  ;;  %s408_s7 = sld [smem:[#allocation5 + $0x83]] }
  0x32   :  { %v84_v17 = vmul.f32 %v83_v16, %v590_v10  ;;  %v87_v18 = vstv %s404_s29  ;;  %s597_s8 = sld [smem:[#allocation6 + $0x1]] }
  0x33   :  { %v81_v19 = vadd.f32 %v80_v15, %v77_v13  ;;  %v88_v20 = vmul.f32 %v87_v18, %v592_v11  ;;  %s411_s9 = sld [smem:[#allocation5 + $0x100]]  ;;  %v91_v25 = vstv %s588_s30 }
  0x34   :  { %v96_v21 = vstv %s405_s4  ;;  %s412_s10 = sld [smem:[#allocation5 + $0x101]] }
  0x35   :  { %v85_v22 = vadd.f32 %v84_v17, %v81_v19  ;;  %v97_v23 = vmul.f32 %v96_v21, %v584_v8  ;;  %v99_v24 = vstv %s406_s5  ;;  %s413_s11 = sld [smem:[#allocation5 + $0x102]] }
  0x36   :  { %v100_v26 = vmul.f32 %v99_v24, %v586_v9  ;;  %v103_v27 = vstv %s407_s6  ;;  %s414_s12 = sld [smem:[#allocation5 + $0x103]] }
  0x37   :  { %v89_v28 = vadd.f32 %v88_v20, %v85_v22  ;;  %v104_v29 = vmul.f32 %v103_v27, %v590_v10  ;;  %v107_v30 = vstv %s408_s7  ;;  %s604_s13 = sld [smem:[#allocation6 + $0x2]] }
  0x38   :  { %v101_v31 = vadd.f32 %v100_v26, %v97_v23  ;;  %v108_v32 = vmul.f32 %v107_v30, %v592_v11  ;;  %s417_s14 = sld [smem:[#allocation5 + $0x180]]  ;;  %v111_v38 = vstv %s597_s8 }
  0x39   :  { %v92_v33 = vadd.f32 %v91_v25, %v89_v28  ;;  %v116_v34 = vstv %s411_s9  ;;  %s418_s15 = sld [smem:[#allocation5 + $0x181]] }
  0x3a   :  { %v105_v35 = vadd.f32 %v104_v29, %v101_v31  ;;  %v117_v36 = vmul.f32 %v116_v34, %v584_v8  ;;  %v119_v37 = vstv %s412_s10  ;;  %s419_s16 = sld [smem:[#allocation5 + $0x182]] }
  0x3b   :  { %94 = vst.msk [vmem:[%s768_s3 - $0x1] sm:$0xfe] %vm93_vm0, %v92_v33  ;;  %v120_v39 = vmul.f32 %v119_v37, %v586_v9  ;;  %v123_v40 = vstv %s413_s11  ;;  %s420_s19 = sld [smem:[#allocation5 + $0x183]] }
  0x3c   :  { %v109_v41 = vadd.f32 %v108_v32, %v105_v35  ;;  %v124_v42 = vmul.f32 %v123_v40, %v590_v10  ;;  %v127_v43 = vstv %s414_s12  ;;  %s615_s20 = sld [smem:[#allocation6 + $0x3]] }
  0x3d   :  { %v121_v44 = vadd.f32 %v120_v39, %v117_v36  ;;  %v128_v45 = vmul.f32 %v127_v43, %v592_v11  ;;  %s423_s21 = sld [smem:[#allocation5 + $0x200]]  ;;  %v131_v51 = vstv %s604_s13 }
  0x3e   :  { %v112_v46 = vadd.f32 %v111_v38, %v109_v41  ;;  %v136_v47 = vstv %s417_s14  ;;  %s424_s22 = sld [smem:[#allocation5 + $0x201]] }
  0x3f   :  { %v125_v48 = vadd.f32 %v124_v42, %v121_v44  ;;  %v137_v49 = vmul.f32 %v136_v47, %v584_v8  ;;  %v139_v50 = vstv %s418_s15  ;;  %s425_s1 = sld [smem:[#allocation5 + $0x202]] }
  0x40   :  { %410 = vst.msk [vmem:[%s768_s3 + $0x7] sm:$0xfe] %vm93_vm0, %v112_v46  ;;  %v140_v52 = vmul.f32 %v139_v50, %v586_v9  ;;  %v143_v53 = vstv %s419_s16  ;;  %s426_s25 = sld [smem:[#allocation5 + $0x203]] }
  0x41   :  { %v129_v54 = vadd.f32 %v128_v45, %v125_v48  ;;  %v144_v55 = vmul.f32 %v143_v53, %v590_v10  ;;  %v147_v56 = vstv %s420_s19  ;;  %s626_s26 = sld [smem:[#allocation6 + $0x4]] }
  0x42   :  { %v141_v57 = vadd.f32 %v140_v52, %v137_v49  ;;  %v148_v58 = vmul.f32 %v147_v56, %v592_v11  ;;  %s429_s0 = sld [smem:[#allocation5 + $0x280]]  ;;  %v151_v0 = vstv %s615_s20 }
  0x43   :  { %v132_v59 = vadd.f32 %v131_v51, %v129_v54  ;;  %v156_v60 = vstv %s423_s21  ;;  %s430_s2 = sld [smem:[#allocation5 + $0x281]] }
  0x44   :  { %v145_v61 = vadd.f32 %v144_v55, %v141_v57  ;;  %v157_v62 = vmul.f32 %v156_v60, %v584_v8  ;;  %v159_v63 = vstv %s424_s22  ;;  %s431_s27 = sld [smem:[#allocation5 + $0x282]] }
  0x45   :  { %416 = vst.msk [vmem:[%s768_s3 + $0xf] sm:$0xfe] %vm93_vm0, %v132_v59  ;;  %v160_v1 = vmul.f32 %v159_v63, %v586_v9  ;;  %v163_v2 = vstv %s425_s1  ;;  %s432_s30 = sld [smem:[#allocation5 + $0x283]] }
  0x46   :  { %v149_v3 = vadd.f32 %v148_v58, %v145_v61  ;;  %v164_v4 = vmul.f32 %v163_v2, %v590_v10  ;;  %v167_v5 = vstv %s426_s25  ;;  %s637_s4 = sld [smem:[#allocation6 + $0x5]] }
  0x47   :  { %v161_v6 = vadd.f32 %v160_v1, %v157_v62  ;;  %v168_v7 = vmul.f32 %v167_v5, %v592_v11  ;;  %s435_s5 = sld [smem:[#allocation5 + $0x300]]  ;;  %v171_v17 = vstv %s626_s26 }
  0x48   :  { %v152_v12 = vadd.f32 %v151_v0, %v149_v3  ;;  %v176_v13 = vstv %s429_s0  ;;  %s436_s6 = sld [smem:[#allocation5 + $0x301]] }
  0x49   :  { %v165_v14 = vadd.f32 %v164_v4, %v161_v6  ;;  %v177_v15 = vmul.f32 %v176_v13, %v584_v8  ;;  %v179_v16 = vstv %s430_s2  ;;  %s437_s7 = sld [smem:[#allocation5 + $0x302]] }
  0x4a   :  { %422 = vst.msk [vmem:[%s768_s3 + $0x17] sm:$0xfe] %vm93_vm0, %v152_v12  ;;  %v180_v18 = vmul.f32 %v179_v16, %v586_v9  ;;  %v183_v19 = vstv %s431_s27  ;;  %s438_s10 = sld [smem:[#allocation5 + $0x303]] }
  0x4b   :  { %v169_v20 = vadd.f32 %v168_v7, %v165_v14  ;;  %v184_v21 = vmul.f32 %v183_v19, %v590_v10  ;;  %v187_v22 = vstv %s432_s30  ;;  %s648_s11 = sld [smem:[#allocation6 + $0x6]] }
  0x4c   :  { %v181_v23 = vadd.f32 %v180_v18, %v177_v15  ;;  %v188_v24 = vmul.f32 %v187_v22, %v592_v11  ;;  %s441_s12 = sld [smem:[#allocation5 + $0x380]]  ;;  %v191_v30 = vstv %s637_s4 }
  0x4d   :  { %v172_v25 = vadd.f32 %v171_v17, %v169_v20  ;;  %v196_v26 = vstv %s435_s5  ;;  %s442_s13 = sld [smem:[#allocation5 + $0x381]] }
  0x4e   :  { %v185_v27 = vadd.f32 %v184_v21, %v181_v23  ;;  %v197_v28 = vmul.f32 %v196_v26, %v584_v8  ;;  %v199_v29 = vstv %s436_s6  ;;  %s443_s14 = sld [smem:[#allocation5 + $0x382]] }
  0x4f   :  { %428 = vst.msk [vmem:[%s768_s3 + $0x1f] sm:$0xfe] %vm93_vm0, %v172_v25  ;;  %v200_v31 = vmul.f32 %v199_v29, %v586_v9  ;;  %v203_v32 = vstv %s437_s7  ;;  %s444_s17 = sld [smem:[#allocation5 + $0x383]] }
  0x50   :  { %v189_v33 = vadd.f32 %v188_v24, %v185_v27  ;;  %v204_v34 = vmul.f32 %v203_v32, %v590_v10  ;;  %v207_v35 = vstv %s438_s10  ;;  %s659_s18 = sld [smem:[#allocation6 + $0x7]] }
  0x51   :  { %v201_v36 = vadd.f32 %v200_v31, %v197_v28  ;;  %v208_v37 = vmul.f32 %v207_v35, %v592_v11  ;;  %s447_s19 = sld [smem:[#allocation5 + $0x400]]  ;;  %v211_v43 = vstv %s648_s11 }
  0x52   :  { %v192_v38 = vadd.f32 %v191_v30, %v189_v33  ;;  %v216_v39 = vstv %s441_s12  ;;  %s448_s20 = sld [smem:[#allocation5 + $0x401]] }
  0x53   :  { %v205_v40 = vadd.f32 %v204_v34, %v201_v36  ;;  %v217_v41 = vmul.f32 %v216_v39, %v584_v8  ;;  %v219_v42 = vstv %s442_s13  ;;  %s449_s21 = sld [smem:[#allocation5 + $0x402]] }
  0x54   :  { %434 = vst.msk [vmem:[%s768_s3 + $0x27] sm:$0xfe] %vm93_vm0, %v192_v38  ;;  %v220_v44 = vmul.f32 %v219_v42, %v586_v9  ;;  %v223_v45 = vstv %s443_s14  ;;  %s450_s23 = sld [smem:[#allocation5 + $0x403]] }
  0x55   :  { %v209_v46 = vadd.f32 %v208_v37, %v205_v40  ;;  %v224_v47 = vmul.f32 %v223_v45, %v590_v10  ;;  %v227_v48 = vstv %s444_s17  ;;  %s670_s24 = sld [smem:[#allocation6 + $0x8]] }
  0x56   :  { %v221_v49 = vadd.f32 %v220_v44, %v217_v41  ;;  %v228_v50 = vmul.f32 %v227_v48, %v592_v11  ;;  %s453_s25 = sld [smem:[#allocation5 + $0x480]]  ;;  %v231_v56 = vstv %s659_s18 }
  0x57   :  { %v212_v51 = vadd.f32 %v211_v43, %v209_v46  ;;  %v236_v52 = vstv %s447_s19  ;;  %s454_s26 = sld [smem:[#allocation5 + $0x481]] }
  0x58   :  { %v225_v53 = vadd.f32 %v224_v47, %v221_v49  ;;  %v237_v54 = vmul.f32 %v236_v52, %v584_v8  ;;  %v239_v55 = vstv %s448_s20  ;;  %s455_s0 = sld [smem:[#allocation5 + $0x482]] }
  0x59   :  { %440 = vst.msk [vmem:[%s768_s3 + $0x2f] sm:$0xfe] %vm93_vm0, %v212_v51  ;;  %v240_v57 = vmul.f32 %v239_v55, %v586_v9  ;;  %v243_v58 = vstv %s449_s21  ;;  %s456_s28 = sld [smem:[#allocation5 + $0x483]] }
  0x5a   :  { %v229_v59 = vadd.f32 %v228_v50, %v225_v53  ;;  %v244_v60 = vmul.f32 %v243_v58, %v590_v10  ;;  %v247_v61 = vstv %s450_s23  ;;  %s681_s29 = sld [smem:[#allocation6 + $0x9]] }
  0x5b   :  { %v241_v62 = vadd.f32 %v240_v57, %v237_v54  ;;  %v248_v63 = vmul.f32 %v247_v61, %v592_v11  ;;  %s459_s30 = sld [smem:[#allocation5 + $0x500]]  ;;  %v251_v5 = vstv %s670_s24 }
  0x5c   :  { %v232_v0 = vadd.f32 %v231_v56, %v229_v59  ;;  %v256_v1 = vstv %s453_s25  ;;  %s460_s4 = sld [smem:[#allocation5 + $0x501]] }
  0x5d   :  { %v245_v2 = vadd.f32 %v244_v60, %v241_v62  ;;  %v257_v3 = vmul.f32 %v256_v1, %v584_v8  ;;  %v259_v4 = vstv %s454_s26  ;;  %s461_s5 = sld [smem:[#allocation5 + $0x502]] }
  0x5e   :  { %446 = vst.msk [vmem:[%s768_s3 + $0x37] sm:$0xfe] %vm93_vm0, %v232_v0  ;;  %v260_v6 = vmul.f32 %v259_v4, %v586_v9  ;;  %v263_v7 = vstv %s455_s0  ;;  %s462_s8 = sld [smem:[#allocation5 + $0x503]] }
  0x5f   :  { %v249_v12 = vadd.f32 %v248_v63, %v245_v2  ;;  %v264_v13 = vmul.f32 %v263_v7, %v590_v10  ;;  %v267_v14 = vstv %s456_s28  ;;  %s692_s9 = sld [smem:[#allocation6 + $0xa]] }
  0x60   :  { %v261_v15 = vadd.f32 %v260_v6, %v257_v3  ;;  %v268_v16 = vmul.f32 %v267_v14, %v592_v11  ;;  %s465_s10 = sld [smem:[#allocation5 + $0x580]]  ;;  %v271_v22 = vstv %s681_s29 }
  0x61   :  { %v252_v17 = vadd.f32 %v251_v5, %v249_v12  ;;  %v276_v18 = vstv %s459_s30  ;;  %s466_s11 = sld [smem:[#allocation5 + $0x581]] }
  0x62   :  { %v265_v19 = vadd.f32 %v264_v13, %v261_v15  ;;  %v277_v20 = vmul.f32 %v276_v18, %v584_v8  ;;  %v279_v21 = vstv %s460_s4  ;;  %s467_s12 = sld [smem:[#allocation5 + $0x582]] }
  0x63   :  { %452 = vst.msk [vmem:[%s768_s3 + $0x3f] sm:$0xfe] %vm93_vm0, %v252_v17  ;;  %v280_v23 = vmul.f32 %v279_v21, %v586_v9  ;;  %v283_v24 = vstv %s461_s5  ;;  %s468_s15 = sld [smem:[#allocation5 + $0x583]] }
  0x64   :  { %v269_v25 = vadd.f32 %v268_v16, %v265_v19  ;;  %v284_v26 = vmul.f32 %v283_v24, %v590_v10  ;;  %v287_v27 = vstv %s462_s8  ;;  %s703_s16 = sld [smem:[#allocation6 + $0xb]] }
  0x65   :  { %v281_v28 = vadd.f32 %v280_v23, %v277_v20  ;;  %v288_v29 = vmul.f32 %v287_v27, %v592_v11  ;;  %s471_s17 = sld [smem:[#allocation5 + $0x600]]  ;;  %v291_v35 = vstv %s692_s9 }
  0x66   :  { %v272_v30 = vadd.f32 %v271_v22, %v269_v25  ;;  %v296_v31 = vstv %s465_s10  ;;  %s472_s18 = sld [smem:[#allocation5 + $0x601]] }
  0x67   :  { %v285_v32 = vadd.f32 %v284_v26, %v281_v28  ;;  %v297_v33 = vmul.f32 %v296_v31, %v584_v8  ;;  %v299_v34 = vstv %s466_s11  ;;  %s473_s19 = sld [smem:[#allocation5 + $0x602]] }
  0x68   :  { %458 = vst.msk [vmem:[%s768_s3 + $0x47] sm:$0xfe] %vm93_vm0, %v272_v30  ;;  %v300_v36 = vmul.f32 %v299_v34, %v586_v9  ;;  %v303_v37 = vstv %s467_s12  ;;  %s474_s22 = sld [smem:[#allocation5 + $0x603]] }
  0x69   :  { %v289_v38 = vadd.f32 %v288_v29, %v285_v32  ;;  %v304_v39 = vmul.f32 %v303_v37, %v590_v10  ;;  %v307_v40 = vstv %s468_s15  ;;  %s714_s1 = sld [smem:[#allocation6 + $0xc]] }
  0x6a   :  { %v301_v41 = vadd.f32 %v300_v36, %v297_v33  ;;  %v308_v42 = vmul.f32 %v307_v40, %v592_v11  ;;  %s477_s23 = sld [smem:[#allocation5 + $0x680]]  ;;  %v311_v48 = vstv %s703_s16 }
  0x6b   :  { %v292_v43 = vadd.f32 %v291_v35, %v289_v38  ;;  %v316_v44 = vstv %s471_s17  ;;  %s478_s24 = sld [smem:[#allocation5 + $0x681]] }
  0x6c   :  { %v305_v45 = vadd.f32 %v304_v39, %v301_v41  ;;  %v317_v46 = vmul.f32 %v316_v44, %v584_v8  ;;  %v319_v47 = vstv %s472_s18  ;;  %s479_s25 = sld [smem:[#allocation5 + $0x682]] }
  0x6d   :  { %464 = vst.msk [vmem:[%s768_s3 + $0x4f] sm:$0xfe] %vm93_vm0, %v292_v43  ;;  %v320_v49 = vmul.f32 %v319_v47, %v586_v9  ;;  %v323_v50 = vstv %s473_s19  ;;  %s480_s2 = sld [smem:[#allocation5 + $0x683]] }
  0x6e   :  { %v309_v51 = vadd.f32 %v308_v42, %v305_v45  ;;  %v324_v52 = vmul.f32 %v323_v50, %v590_v10  ;;  %v327_v53 = vstv %s474_s22  ;;  %s725_s27 = sld [smem:[#allocation6 + $0xd]] }
  0x6f   :  { %v321_v54 = vadd.f32 %v320_v49, %v317_v46  ;;  %v328_v55 = vmul.f32 %v327_v53, %v592_v11  ;;  %s483_s28 = sld [smem:[#allocation5 + $0x700]]  ;;  %v331_v61 = vstv %s714_s1 }
  0x70   :  { %v312_v56 = vadd.f32 %v311_v48, %v309_v51  ;;  %v336_v57 = vstv %s477_s23  ;;  %s484_s29 = sld [smem:[#allocation5 + $0x701]] }
  0x71   :  { %v325_v58 = vadd.f32 %v324_v52, %v321_v54  ;;  %v337_v59 = vmul.f32 %v336_v57, %v584_v8  ;;  %v339_v60 = vstv %s478_s24  ;;  %s485_s30 = sld [smem:[#allocation5 + $0x702]] }
  0x72   :  { %470 = vst.msk [vmem:[%s768_s3 + $0x57] sm:$0xfe] %vm93_vm0, %v312_v56  ;;  %v340_v62 = vmul.f32 %v339_v60, %v586_v9  ;;  %v343_v63 = vstv %s479_s25  ;;  %s486_s6 = sld [smem:[#allocation5 + $0x703]] }
  0x73   :  { %v329_v0 = vadd.f32 %v328_v55, %v325_v58  ;;  %v344_v1 = vmul.f32 %v343_v63, %v590_v10  ;;  %v347_v2 = vstv %s480_s2  ;;  %s736_s7 = sld [smem:[#allocation6 + $0xe]] }
  0x74   :  { %v341_v3 = vadd.f32 %v340_v62, %v337_v59  ;;  %v348_v4 = vmul.f32 %v347_v2, %v592_v11  ;;  %s489_s8 = sld [smem:[#allocation5 + $0x780]]  ;;  %v351_v14 = vstv %s725_s27 }
  0x75   :  { %v332_v5 = vadd.f32 %v331_v61, %v329_v0  ;;  %v356_v6 = vstv %s483_s28  ;;  %s490_s9 = sld [smem:[#allocation5 + $0x781]] }
  0x76   :  { %v345_v7 = vadd.f32 %v344_v1, %v341_v3  ;;  %v357_v12 = vmul.f32 %v356_v6, %v584_v8  ;;  %v359_v13 = vstv %s484_s29  ;;  %s491_s10 = sld [smem:[#allocation5 + $0x782]] }
  0x77   :  { %476 = vst.msk [vmem:[%s768_s3 + $0x5f] sm:$0xfe] %vm93_vm0, %v332_v5  ;;  %v360_v15 = vmul.f32 %v359_v13, %v586_v9  ;;  %v363_v16 = vstv %s485_s30  ;;  %s492_s13 = sld [smem:[#allocation5 + $0x783]] }
  0x78   :  { %v349_v17 = vadd.f32 %v348_v4, %v345_v7  ;;  %v364_v18 = vmul.f32 %v363_v16, %v590_v10  ;;  %v367_v19 = vstv %s486_s6  ;;  %s493_s14 = sld [smem:[#allocation6 + $0xf]] }
  0x79   :  { %v361_v20 = vadd.f32 %v360_v15, %v357_v12  ;;  %v368_v21 = vmul.f32 %v367_v19, %v592_v11  ;;  %v371_v27 = vstv %s736_s7 }
  0x7a   :  { %v352_v22 = vadd.f32 %v351_v14, %v349_v17  ;;  %v376_v23 = vstv %s489_s8 }
  0x7b   :  { %v365_v24 = vadd.f32 %v364_v18, %v361_v20  ;;  %v377_v25 = vmul.f32 %v376_v23, %v584_v8  ;;  %v379_v26 = vstv %s490_s9 }
  0x7c   :  { %482 = vst.msk [vmem:[%s768_s3 + $0x67] sm:$0xfe] %vm93_vm0, %v352_v22  ;;  %v380_v28 = vmul.f32 %v379_v26, %v586_v9  ;;  %v383_v29 = vstv %s491_s10 }
  0x7d   :  { %v369_v30 = vadd.f32 %v368_v21, %v365_v24  ;;  %v384_v31 = vmul.f32 %v383_v29, %v590_v10  ;;  %v387_v32 = vstv %s492_s13 }
  0x7e   :  { %v381_v33 = vadd.f32 %v380_v28, %v377_v25  ;;  %v388_v34 = vmul.f32 %v387_v32, %v592_v11  ;;  %v391_v8 = vstv %s493_s14 }
  0x7f   :  { %v372_v35 = vadd.f32 %v371_v27, %v369_v30 }
  0x80   :  { %v385_v36 = vadd.f32 %v384_v31, %v381_v33 }
  0x81   :  { %488 = vst.msk [vmem:[%s768_s3 + $0x6f] sm:$0xfe] %vm93_vm0, %v372_v35 }
  0x82   :  { %v389_v37 = vadd.f32 %v388_v34, %v385_v36 }
  0x84   :  { %v392_v38 = vadd.f32 %v391_v8, %v389_v37 }
  0x86   :  { %494 = vst.msk [vmem:[%s768_s3 + $0x77] sm:$0xfe] %vm93_vm0, %v392_v38 }
  0x87   :  { %399 = vsyncpa [#allocation3], 1 }
  0x88   :  { %400 = vsyncpa [#allocation4], 1 }
  0x89   :  { %401 = vsyncpa [#allocation7], 1 }

</bundles_post_ra>
